<compile_context>
chip_gen: v7x
topology: tpu7x:2x2x1
jax: 0.10.0
libtpu: 0.0.40
codegen_flags: <defaults>
</compile_context>

<pallas_src>
import functools

import jax
import jax.numpy as jnp
from jax.experimental import pallas as pl
from jax.experimental.pallas import tpu as pltpu

_H1, _H2 = 300, 400  # hidden widths from the PyTorch module

# Probed once: does this jax build accept pl.Buffered(1) on pallas_call BlockSpecs?
_SINGLE_BUFFER_WEIGHTS = {"ok": None}


def _round_up(x, m):
    return (x + m - 1) // m * m


def _actor_kernel(x_ref, w1_ref, b1_ref, w2_ref, b2_ref, w3_ref, b3_ref, o_ref,
                  *, max_action):
    # Layer 1: relu(x @ W1 + b1)   [TB, S] @ [S, 384] -> [TB, 384]
    # f32 MXU accumulate; the relu output is materialized in the weight dtype (bf16)
    # so intermediate VMEM traffic is half-width on v6e/v7x.  The add/relu math is f32.
    x = x_ref[...].astype(w1_ref.dtype)
    a1 = jnp.dot(x, w1_ref[...], preferred_element_type=jnp.float32)
    h1 = jnp.maximum(a1 + b1_ref[...], 0.0).astype(w2_ref.dtype)

    # Layer 2: relu(h1 @ W2 + b2)  [TB, 384] @ [384, 512] -> [TB, 512]
    a2 = jnp.dot(h1, w2_ref[...], preferred_element_type=jnp.float32)
    h2 = jnp.maximum(a2 + b2_ref[...], 0.0).astype(w3_ref.dtype)

    # Output: max_action * tanh(h2 @ W3 + b3)  [TB, 512] @ [512, AP] -> [TB, AP]
    a3 = jnp.dot(h2, w3_ref[...], preferred_element_type=jnp.float32) + b3_ref[...]
    o_ref[...] = (max_action * jnp.tanh(a3)).astype(o_ref.dtype)


def actor_forward(state, params, max_action, action_size, *, block_b=1024,
                  slice_output=True):
    """Fused 3-layer MLP. state: [B, state_size] f32.

    Returns [B, action_size] f32 (or the padded [B, AP] output if slice_output=False,
    which skips one XLA copy for consumers that can handle the 128-lane layout).
    """
    w1, b1, w2, b2, w3, b3 = params
    B, S = state.shape
    AP = w3.shape[1]  # padded action width (multiple of 128)

    # Batch tile: multiple of 8 sublanes, capped at block_b.  No wrapper-side padding:
    # Pallas masks the ragged last tile (rows are fully independent).
    tb = min(block_b, _round_up(B, 8))
    if B > 8 and pl.cdiv(B, tb) < 2:
        # Guarantee >=2 grid steps so the "parallel" batch axis can use both v7x cores.
        tb = _round_up(pl.cdiv(B, 2), 8)
    grid = (pl.cdiv(B, tb),)

    kernel = functools.partial(_actor_kernel, max_action=float(max_action))

    def call(single_buffer_weights):
        def resident(shape):
            # Constant block index: weights stay put across grid steps (no re-DMA).
            if single_buffer_weights:
                return pl.BlockSpec(shape, lambda i: (0, 0),
                                    pipeline_mode=pl.Buffered(1))
            return pl.BlockSpec(shape, lambda i: (0, 0))

        return pl.pallas_call(
            kernel,
            out_shape=jax.ShapeDtypeStruct((B, AP), jnp.float32),
            grid=grid,
            in_specs=[
                pl.BlockSpec((tb, S), lambda i: (i, 0)),
                resident(w1.shape), resident(b1.shape),
                resident(w2.shape), resident(b2.shape),
                resident(w3.shape), resident(b3.shape),
            ],
            out_specs=pl.BlockSpec((tb, AP), lambda i: (i, 0)),
            compiler_params=pltpu.CompilerParams(
                dimension_semantics=("parallel",),
                vmem_limit_bytes=32 << 20,
            ),
        )(state, w1, b1, w2, b2, w3, b3)

    if _SINGLE_BUFFER_WEIGHTS["ok"] is False:
        out = call(False)
    else:
        try:
            out = call(True)
            _SINGLE_BUFFER_WEIGHTS["ok"] = True
        except Exception:
            # pl.Buffered(1) not supported for this pallas_call in this jax build:
            # fall back to default (double-buffered) weight specs, which is still
            # correct and only costs ~0.5 MB of extra VMEM.
            _SINGLE_BUFFER_WEIGHTS["ok"] = False
            out = call(False)

    if slice_output:
        out = out[:, :action_size]
    # NOTE: at inference-sized batches (B~8) this call is launch + weight-DMA bound;
    # batch multiple env states per call to amortize the fixed cost.
    return out


def init_actor_params(key, state_size, action_size):
    """f32 params with PyTorch nn.Linear-style init (uniform +-1/sqrt(fan_in)).
    Weights stored [in, out] (transposed vs torch) and zero-padded to 128-lane
    multiples; padded bias/weight entries are zero so padding is numerically inert."""
    h1p = _round_up(_H1, 128)
    h2p = _round_up(_H2, 128)
    ap = _round_up(action_size, 128)

    def linear(key, fan_in, fan_out, in_pad, out_pad):
        kw, kb = jax.random.split(key)
        bound = 1.0 / float(fan_in) ** 0.5
        w = jax.random.uniform(kw, (fan_in, fan_out), jnp.float32, -bound, bound)
        b = jax.random.uniform(kb, (1, fan_out), jnp.float32, -bound, bound)
        w = jnp.pad(w, ((0, in_pad - fan_in), (0, out_pad - fan_out)))
        b = jnp.pad(b, ((0, 0), (0, out_pad - fan_out)))
        return w, b

    k1, k2, k3 = jax.random.split(key, 3)
    # TODO(synk): if real deployments have state_size not 128-aligned, pad the state
    # feature dim to 128 at data-prep time for a lane-dense layer-1 LHS.
    w1, b1 = linear(k1, state_size, _H1, state_size, h1p)
    w2, b2 = linear(k2, _H1, _H2, h1p, h2p)
    w3, b3 = linear(k3, _H2, action_size, h2p, ap)
    return (w1, b1, w2, b2, w3, b3)


def cast_params_for_mxu(params):
    """bf16 weights for full-rate MXU; biases stay f32 (bias/relu/tanh math is f32).
    (fp8 on v7x / int8 on v6e are possible further wins but need accuracy validation.)"""
    w1, b1, w2, b2, w3, b3 = params
    bf = jnp.bfloat16
    return (w1.astype(bf), b1, w2.astype(bf), b2, w3.astype(bf), b3)


def actor_reference(state, params, max_action, action_size):
    """Pure-JAX reference with the same dtype strategy as the kernel (bf16 intermediates
    when given bf16 weights, pure f32 when given f32 weights)."""
    w1, b1, w2, b2, w3, b3 = params
    h1 = jnp.maximum(jnp.dot(state.astype(w1.dtype), w1,
                             preferred_element_type=jnp.float32) + b1, 0.0).astype(w2.dtype)
    h2 = jnp.maximum(jnp.dot(h1, w2,
                             preferred_element_type=jnp.float32) + b2, 0.0).astype(w3.dtype)
    y = jnp.dot(h2, w3, preferred_element_type=jnp.float32) + b3
    return (max_action * jnp.tanh(y))[:, :action_size]


if __name__ == "__main__":
    # Small shapes consistent with the module: batch=8, state_size=32, action_size=8.
    batch, state_size, action_size = 8, 32, 8
    max_action = 2.0

    key = jax.random.PRNGKey(0)
    k_params, k_s1, k_s2, k_s3 = jax.random.split(key, 4)
    params_f32 = init_actor_params(k_params, state_size, action_size)
    params = cast_params_for_mxu(params_f32)

    state = jax.random.normal(k_s1, (batch, state_size), jnp.float32)
    out = jax.block_until_ready(actor_forward(state, params, max_action, action_size))
    assert out.shape == (batch, action_size), out.shape

    # Tight check vs a reference doing identical bf16-weights / f32-accumulate math.
    ref_bf16 = actor_reference(state, params, max_action, action_size)
    assert jnp.allclose(out, ref_bf16, atol=2e-3, rtol=2e-3), "mismatch vs bf16 reference"

    # Loose check vs full-f32 (torch-semantics) reference: only bf16 quantization error.
    ref_f32 = actor_reference(state, params_f32, max_action, action_size)
    assert float(jnp.max(jnp.abs(out - ref_f32))) < 5e-2, "mismatch vs f32 reference"

    # Mid-size batch: forces >=2 grid steps (megacore path) with a ragged last tile
    # (B=500 -> tb=256, 2 steps) and no wrapper-side padding/copy.
    s2 = jax.random.normal(k_s2, (500, state_size), jnp.float32)
    o2 = jax.block_until_ready(actor_forward(s2, params, max_action, action_size))
    assert o2.shape == (500, action_size), o2.shape
    assert jnp.allclose(o2, actor_reference(s2, params, max_action, action_size),
                        atol=2e-3, rtol=2e-3), "mismatch (2-step grid, ragged tile)"

    # Large batch: full 1024-row tiles, 3 grid steps, ragged last tile.
    s3 = jax.random.normal(k_s3, (2500, state_size), jnp.float32)
    o3 = jax.block_until_ready(actor_forward(s3, params, max_action, action_size))
    assert o3.shape == (2500, action_size), o3.shape
    assert jnp.allclose(o3, actor_reference(s3, params, max_action, action_size),
                        atol=2e-3, rtol=2e-3), "mismatch (large-batch grid)"

    print("KERNEL_OK")
</pallas_src>

<mosaic_0001>
module attributes {stable_mosaic.version = 11 : i64} {
  func.func @_actor_kernel(%arg0: i32, %arg1: memref<8x32xf32, #tpu.memory_space<vmem>>, %arg2: memref<32x384xbf16, #tpu.memory_space<vmem>>, %arg3: memref<1x384xf32, #tpu.memory_space<vmem>>, %arg4: memref<384x512xbf16, #tpu.memory_space<vmem>>, %arg5: memref<1x512xf32, #tpu.memory_space<vmem>>, %arg6: memref<512x128xbf16, #tpu.memory_space<vmem>>, %arg7: memref<1x128xf32, #tpu.memory_space<vmem>>, %arg8: memref<8x128xf32, #tpu.memory_space<vmem>>) attributes {dimension_semantics = [#tpu.dimension_semantics<parallel>], iteration_bounds = array<i64: 1>, scalar_prefetch = 0 : i64, scratch_operands = 0 : i64, tpu.core_type = #tpu.core_type<tc>, window_params = [{transform_indices = @transform_0, window_bounds = array<i64: 8, 32>}, {pipeline_mode = #tpu.pipeline_mode<synchronous>, transform_indices = @transform_1, window_bounds = array<i64: 32, 384>}, {pipeline_mode = #tpu.pipeline_mode<synchronous>, transform_indices = @transform_2, window_bounds = array<i64: 1, 384>}, {pipeline_mode = #tpu.pipeline_mode<synchronous>, transform_indices = @transform_3, window_bounds = array<i64: 384, 512>}, {pipeline_mode = #tpu.pipeline_mode<synchronous>, transform_indices = @transform_4, window_bounds = array<i64: 1, 512>}, {pipeline_mode = #tpu.pipeline_mode<synchronous>, transform_indices = @transform_5, window_bounds = array<i64: 512, 128>}, {pipeline_mode = #tpu.pipeline_mode<synchronous>, transform_indices = @transform_6, window_bounds = array<i64: 1, 128>}, {transform_indices = @transform_7, window_bounds = array<i64: 8, 128>}]} {
    %c0 = arith.constant 0 : index
    %c0_0 = arith.constant 0 : index
    %0 = vector.load %arg1[%c0, %c0_0] : memref<8x32xf32, #tpu.memory_space<vmem>>, vector<8x32xf32>
    %1 = arith.truncf %0 : vector<8x32xf32> to vector<8x32xbf16>
    %c0_1 = arith.constant 0 : index
    %c0_2 = arith.constant 0 : index
    %2 = vector.load %arg2[%c0_1, %c0_2] : memref<32x384xbf16, #tpu.memory_space<vmem>>, vector<32x384xbf16>
    %cst = arith.constant dense<0.000000e+00> : vector<8x384xf32>
    %3 = tpu.matmul %1, %2, %cst {dimension_numbers = #tpu.dot_dimension_numbers<[1], [0], [0], [1], [0, 0, 1, 1], [], []>} : vector<8x32xbf16>, vector<32x384xbf16>, vector<8x384xf32> -> vector<8x384xf32>
    %c0_3 = arith.constant 0 : index
    %c0_4 = arith.constant 0 : index
    %4 = vector.load %arg3[%c0_3, %c0_4] : memref<1x384xf32, #tpu.memory_space<vmem>>, vector<1x384xf32>
    %5 = vector.broadcast %4 : vector<1x384xf32> to vector<8x384xf32>
    %6 = arith.addf %3, %5 : vector<8x384xf32>
    %cst_5 = arith.constant 0.000000e+00 : f32
    %7 = vector.broadcast %cst_5 : f32 to vector<8x384xf32>
    %8 = arith.maximumf %6, %7 : vector<8x384xf32>
    %9 = arith.truncf %8 : vector<8x384xf32> to vector<8x384xbf16>
    %c0_6 = arith.constant 0 : index
    %c0_7 = arith.constant 0 : index
    %10 = vector.load %arg4[%c0_6, %c0_7] : memref<384x512xbf16, #tpu.memory_space<vmem>>, vector<384x512xbf16>
    %cst_8 = arith.constant dense<0.000000e+00> : vector<8x512xf32>
    %11 = tpu.matmul %9, %10, %cst_8 {dimension_numbers = #tpu.dot_dimension_numbers<[1], [0], [0], [1], [0, 0, 1, 1], [], []>} : vector<8x384xbf16>, vector<384x512xbf16>, vector<8x512xf32> -> vector<8x512xf32>
    %c0_9 = arith.constant 0 : index
    %c0_10 = arith.constant 0 : index
    %12 = vector.load %arg5[%c0_9, %c0_10] : memref<1x512xf32, #tpu.memory_space<vmem>>, vector<1x512xf32>
    %13 = vector.broadcast %12 : vector<1x512xf32> to vector<8x512xf32>
    %14 = arith.addf %11, %13 : vector<8x512xf32>
    %cst_11 = arith.constant 0.000000e+00 : f32
    %15 = vector.broadcast %cst_11 : f32 to vector<8x512xf32>
    %16 = arith.maximumf %14, %15 : vector<8x512xf32>
    %17 = arith.truncf %16 : vector<8x512xf32> to vector<8x512xbf16>
    %c0_12 = arith.constant 0 : index
    %c0_13 = arith.constant 0 : index
    %18 = vector.load %arg6[%c0_12, %c0_13] : memref<512x128xbf16, #tpu.memory_space<vmem>>, vector<512x128xbf16>
    %cst_14 = arith.constant dense<0.000000e+00> : vector<8x128xf32>
    %19 = tpu.matmul %17, %18, %cst_14 {dimension_numbers = #tpu.dot_dimension_numbers<[1], [0], [0], [1], [0, 0, 1, 1], [], []>} : vector<8x512xbf16>, vector<512x128xbf16>, vector<8x128xf32> -> vector<8x128xf32>
    %c0_15 = arith.constant 0 : index
    %c0_16 = arith.constant 0 : index
    %20 = vector.load %arg7[%c0_15, %c0_16] : memref<1x128xf32, #tpu.memory_space<vmem>>, vector<1x128xf32>
    %21 = vector.broadcast %20 : vector<1x128xf32> to vector<8x128xf32>
    %22 = arith.addf %19, %21 : vector<8x128xf32>
    %23 = math.tanh %22 : vector<8x128xf32>
    %cst_17 = arith.constant 2.000000e+00 : f32
    %24 = vector.broadcast %cst_17 : f32 to vector<8x128xf32>
    %25 = arith.mulf %24, %23 : vector<8x128xf32>
    %c0_18 = arith.constant 0 : index
    %c0_19 = arith.constant 0 : index
    %26 = vector.load %arg8[%c0_18, %c0_19] : memref<8x128xf32, #tpu.memory_space<vmem>>, vector<8x128xf32>
    tpu.vector_store %arg8[%c0_18, %c0_19], %25 {strides = array<i32>} : memref<8x128xf32, #tpu.memory_space<vmem>>, vector<8x128xf32>,
    return
  }
  func.func @transform_0(%arg0: i32) -> (i32, i32) {
    %c0_i32 = arith.constant 0 : i32
    %c0_i32_0 = arith.constant 0 : i32
    return %arg0, %c0_i32 : i32, i32
  }
  func.func @transform_1(%arg0: i32) -> (i32, i32) {
    %c0_i32 = arith.constant 0 : i32
    %c0_i32_0 = arith.constant 0 : i32
    %c0_i32_1 = arith.constant 0 : i32
    return %c0_i32, %c0_i32_0 : i32, i32
  }
  func.func @transform_2(%arg0: i32) -> (i32, i32) {
    %c0_i32 = arith.constant 0 : i32
    %c0_i32_0 = arith.constant 0 : i32
    %c0_i32_1 = arith.constant 0 : i32
    return %c0_i32, %c0_i32_0 : i32, i32
  }
  func.func @transform_3(%arg0: i32) -> (i32, i32) {
    %c0_i32 = arith.constant 0 : i32
    %c0_i32_0 = arith.constant 0 : i32
    %c0_i32_1 = arith.constant 0 : i32
    return %c0_i32, %c0_i32_0 : i32, i32
  }
  func.func @transform_4(%arg0: i32) -> (i32, i32) {
    %c0_i32 = arith.constant 0 : i32
    %c0_i32_0 = arith.constant 0 : i32
    %c0_i32_1 = arith.constant 0 : i32
    return %c0_i32, %c0_i32_0 : i32, i32
  }
  func.func @transform_5(%arg0: i32) -> (i32, i32) {
    %c0_i32 = arith.constant 0 : i32
    %c0_i32_0 = arith.constant 0 : i32
    %c0_i32_1 = arith.constant 0 : i32
    return %c0_i32, %c0_i32_0 : i32, i32
  }
  func.func @transform_6(%arg0: i32) -> (i32, i32) {
    %c0_i32 = arith.constant 0 : i32
    %c0_i32_0 = arith.constant 0 : i32
    %c0_i32_1 = arith.constant 0 : i32
    return %c0_i32, %c0_i32_0 : i32, i32
  }
  func.func @transform_7(%arg0: i32) -> (i32, i32) {
    %c0_i32 = arith.constant 0 : i32
    %c0_i32_0 = arith.constant 0 : i32
    return %arg0, %c0_i32 : i32, i32
  }
}

module attributes {stable_mosaic.version = 11 : i64} {
  func.func @_actor_kernel(%arg0: i32, %arg1: memref<8x32xf32, #tpu.memory_space<vmem>>, %arg2: memref<32x384xbf16, #tpu.memory_space<vmem>>, %arg3: memref<1x384xf32, #tpu.memory_space<vmem>>, %arg4: memref<384x512xbf16, #tpu.memory_space<vmem>>, %arg5: memref<1x512xf32, #tpu.memory_space<vmem>>, %arg6: memref<512x128xbf16, #tpu.memory_space<vmem>>, %arg7: memref<1x128xf32, #tpu.memory_space<vmem>>, %arg8: memref<8x128xf32, #tpu.memory_space<vmem>>) attributes {dimension_semantics = [#tpu.dimension_semantics<parallel>], iteration_bounds = array<i64: 1>, scalar_prefetch = 0 : i64, scratch_operands = 0 : i64, tpu.core_type = #tpu.core_type<tc>, window_params = [{transform_indices = @transform_0, window_bounds = array<i64: 8, 32>}, {pipeline_mode = #tpu.pipeline_mode<synchronous>, transform_indices = @transform_1, window_bounds = array<i64: 32, 384>}, {pipeline_mode = #tpu.pipeline_mode<synchronous>, transform_indices = @transform_2, window_bounds = array<i64: 1, 384>}, {pipeline_mode = #tpu.pipeline_mode<synchronous>, transform_indices = @transform_3, window_bounds = array<i64: 384, 512>}, {pipeline_mode = #tpu.pipeline_mode<synchronous>, transform_indices = @transform_4, window_bounds = array<i64: 1, 512>}, {pipeline_mode = #tpu.pipeline_mode<synchronous>, transform_indices = @transform_5, window_bounds = array<i64: 512, 128>}, {pipeline_mode = #tpu.pipeline_mode<synchronous>, transform_indices = @transform_6, window_bounds = array<i64: 1, 128>}, {transform_indices = @transform_7, window_bounds = array<i64: 8, 128>}]} {
    %c0 = arith.constant 0 : index
    %c0_0 = arith.constant 0 : index
    %0 = vector.load %arg1[%c0, %c0_0] : memref<8x32xf32, #tpu.memory_space<vmem>>, vector<8x32xf32>
    %1 = arith.truncf %0 : vector<8x32xf32> to vector<8x32xbf16>
    %c0_1 = arith.constant 0 : index
    %c0_2 = arith.constant 0 : index
    %2 = vector.load %arg2[%c0_1, %c0_2] : memref<32x384xbf16, #tpu.memory_space<vmem>>, vector<32x384xbf16>
    %cst = arith.constant dense<0.000000e+00> : vector<8x384xf32>
    %3 = tpu.matmul %1, %2, %cst {dimension_numbers = #tpu.dot_dimension_numbers<[1], [0], [0], [1], [0, 0, 1, 1], [], []>} : vector<8x32xbf16>, vector<32x384xbf16>, vector<8x384xf32> -> vector<8x384xf32>
    %c0_3 = arith.constant 0 : index
    %c0_4 = arith.constant 0 : index
    %4 = vector.load %arg3[%c0_3, %c0_4] : memref<1x384xf32, #tpu.memory_space<vmem>>, vector<1x384xf32>
    %5 = vector.broadcast %4 : vector<1x384xf32> to vector<8x384xf32>
    %6 = arith.addf %3, %5 : vector<8x384xf32>
    %cst_5 = arith.constant 0.000000e+00 : f32
    %7 = vector.broadcast %cst_5 : f32 to vector<8x384xf32>
    %8 = arith.maximumf %6, %7 : vector<8x384xf32>
    %9 = arith.truncf %8 : vector<8x384xf32> to vector<8x384xbf16>
    %c0_6 = arith.constant 0 : index
    %c0_7 = arith.constant 0 : index
    %10 = vector.load %arg4[%c0_6, %c0_7] : memref<384x512xbf16, #tpu.memory_space<vmem>>, vector<384x512xbf16>
    %cst_8 = arith.constant dense<0.000000e+00> : vector<8x512xf32>
    %11 = tpu.matmul %9, %10, %cst_8 {dimension_numbers = #tpu.dot_dimension_numbers<[1], [0], [0], [1], [0, 0, 1, 1], [], []>} : vector<8x384xbf16>, vector<384x512xbf16>, vector<8x512xf32> -> vector<8x512xf32>
    %c0_9 = arith.constant 0 : index
    %c0_10 = arith.constant 0 : index
    %12 = vector.load %arg5[%c0_9, %c0_10] : memref<1x512xf32, #tpu.memory_space<vmem>>, vector<1x512xf32>
    %13 = vector.broadcast %12 : vector<1x512xf32> to vector<8x512xf32>
    %14 = arith.addf %11, %13 : vector<8x512xf32>
    %cst_11 = arith.constant 0.000000e+00 : f32
    %15 = vector.broadcast %cst_11 : f32 to vector<8x512xf32>
    %16 = arith.maximumf %14, %15 : vector<8x512xf32>
    %17 = arith.truncf %16 : vector<8x512xf32> to vector<8x512xbf16>
    %c0_12 = arith.constant 0 : index
    %c0_13 = arith.constant 0 : index
    %18 = vector.load %arg6[%c0_12, %c0_13] : memref<512x128xbf16, #tpu.memory_space<vmem>>, vector<512x128xbf16>
    %cst_14 = arith.constant dense<0.000000e+00> : vector<8x128xf32>
    %19 = tpu.matmul %17, %18, %cst_14 {dimension_numbers = #tpu.dot_dimension_numbers<[1], [0], [0], [1], [0, 0, 1, 1], [], []>} : vector<8x512xbf16>, vector<512x128xbf16>, vector<8x128xf32> -> vector<8x128xf32>
    %c0_15 = arith.constant 0 : index
    %c0_16 = arith.constant 0 : index
    %20 = vector.load %arg7[%c0_15, %c0_16] : memref<1x128xf32, #tpu.memory_space<vmem>>, vector<1x128xf32>
    %21 = vector.broadcast %20 : vector<1x128xf32> to vector<8x128xf32>
    %22 = arith.addf %19, %21 : vector<8x128xf32>
    %23 = math.tanh %22 : vector<8x128xf32>
    %cst_17 = arith.constant 2.000000e+00 : f32
    %24 = vector.broadcast %cst_17 : f32 to vector<8x128xf32>
    %25 = arith.mulf %24, %23 : vector<8x128xf32>
    %c0_18 = arith.constant 0 : index
    %c0_19 = arith.constant 0 : index
    %26 = vector.load %arg8[%c0_18, %c0_19] : memref<8x128xf32, #tpu.memory_space<vmem>>, vector<8x128xf32>
    tpu.vector_store %arg8[%c0_18, %c0_19], %25 {strides = array<i32>} : memref<8x128xf32, #tpu.memory_space<vmem>>, vector<8x128xf32>,
    return
  }
  func.func @transform_0(%arg0: i32) -> (i32, i32) {
    %c0_i32 = arith.constant 0 : i32
    %c0_i32_0 = arith.constant 0 : i32
    return %arg0, %c0_i32 : i32, i32
  }
  func.func @transform_1(%arg0: i32) -> (i32, i32) {
    %c0_i32 = arith.constant 0 : i32
    %c0_i32_0 = arith.constant 0 : i32
    %c0_i32_1 = arith.constant 0 : i32
    return %c0_i32, %c0_i32_0 : i32, i32
  }
  func.func @transform_2(%arg0: i32) -> (i32, i32) {
    %c0_i32 = arith.constant 0 : i32
    %c0_i32_0 = arith.constant 0 : i32
    %c0_i32_1 = arith.constant 0 : i32
    return %c0_i32, %c0_i32_0 : i32, i32
  }
  func.func @transform_3(%arg0: i32) -> (i32, i32) {
    %c0_i32 = arith.constant 0 : i32
    %c0_i32_0 = arith.constant 0 : i32
    %c0_i32_1 = arith.constant 0 : i32
    return %c0_i32, %c0_i32_0 : i32, i32
  }
  func.func @transform_4(%arg0: i32) -> (i32, i32) {
    %c0_i32 = arith.constant 0 : i32
    %c0_i32_0 = arith.constant 0 : i32
    %c0_i32_1 = arith.constant 0 : i32
    return %c0_i32, %c0_i32_0 : i32, i32
  }
  func.func @transform_5(%arg0: i32) -> (i32, i32) {
    %c0_i32 = arith.constant 0 : i32
    %c0_i32_0 = arith.constant 0 : i32
    %c0_i32_1 = arith.constant 0 : i32
    return %c0_i32, %c0_i32_0 : i32, i32
  }
  func.func @transform_6(%arg0: i32) -> (i32, i32) {
    %c0_i32 = arith.constant 0 : i32
    %c0_i32_0 = arith.constant 0 : i32
    %c0_i32_1 = arith.constant 0 : i32
    return %c0_i32, %c0_i32_0 : i32, i32
  }
  func.func @transform_7(%arg0: i32) -> (i32, i32) {
    %c0_i32 = arith.constant 0 : i32
    %c0_i32_0 = arith.constant 0 : i32
    return %arg0, %c0_i32 : i32, i32
  }
}

</mosaic_0001>

<bundles_post_ra>
// kernel: tpu_custom_call.1
= control target key start
LH: loop header
LB: loop body
LE: loop exit
PB: predicated region body
PF: predicated region fallthrough
CT: control target
= control target key end

     0   :  { %12 = vsyncpa [#allocation3], 0  ;;  %s2030_s0 = inlined_call_operand.hbm [shape: f32[8,32], index: 0, kind: input, shape index: {}]   ;;  %s2031_s1 = inlined_call_operand.hbm [shape: bf16[32,384], index: 1, kind: input, shape index: {}]   ;;  %s2032_s2 = inlined_call_operand.vmem [shape: f32[1,384], index: 2, kind: input, shape index: {}]   ;;  %s2033_s3 = inlined_call_operand.hbm [shape: bf16[384,512], index: 3, kind: input, shape index: {}]   ;;  %s2034_s4 = inlined_call_operand.vmem [shape: f32[1,512], index: 4, kind: input, shape index: {}]   ;;  %s2035_s5 = inlined_call_operand.hbm [shape: bf16[512,128], index: 5, kind: input, shape index: {}]   ;;  %s2036_s6 = inlined_call_operand.vmem [shape: f32[1,128], index: 6, kind: input, shape index: {}]   ;;  %s2037_s7 = inlined_call_operand.hbm [shape: f32[8,128], index: 7, kind: output, shape index: {}]  }
   0x1   :  { %13 = vsyncpa [#allocation6], 0 }
   0x2   :  { %14 = vsyncpa [#allocation9], 0 }
   0x3   :  { %15 = vsyncpa [#allocation4], 0  ;;  %s1886_s24 = smov [#allocation5]   ;;  %s1768_s28 = scalar_lea.hbm %s2031_s1, 768 }
   0x4   :  { %s31_s25 = sshll.u32 %s1886_s24, 4  ;;  %p1769_p0 = scmp.ne.s32.totalorder %s2031_s1, %s1768_s28  ;;  %s32_s25 = int_to_ptr.vmem [resolvable:$true] %s31_s25 }
   0x5   :  { %p1772_p1 = scmp.lt.u32.totalorder %s1768_s28, %s2031_s1 }
   0x7   :  { %p1774_p2 = pnand %p1772_p1, %p1769_p0 }
   0x9   :  { %1777 = shalt.err (!%p1774_p2)
}
   0xa   :  { %s1778_s10 = scalar_lea.vmem %s32_s25, 768  ;;  %p1783_p4 = scmp.lt.s32.totalorder %s32_s25, %s32_s25 }
   0xb   :  { %p1779_p3 = scmp.ne.s32.totalorder %s32_s25, %s1778_s10  ;;  %p1784_p5 = scmp.lt.s32.totalorder %s1778_s10, %s1778_s10 }
   0xd   :  { %p1785_p6 = por %p1784_p5, %p1783_p4 }
   0xf   :  { %p1786_p7 = pnand %p1785_p6, %p1779_p3 }
  0x11   :  { %1789 = shalt.err (!%p1786_p7)
}
  0x12   :  { %s1887_s11 = smov 192   ;;  %s1888_s12 = smov 12  }
  0x13   :  { %37 = dma.hbm_to_vmem [thread:$0]  %s2031_s1, 768, %s32_s25, [#allocation6], %s1887_s11, %s1887_s11, %s1888_s12  }
  0x14   :  { %s1889_s15 = smov [#allocation2]   ;;  %s1890_s17 = smov [#allocation7]  }
  0x15   :  { %s22_s16 = sshll.u32 %s1889_s15, 4  ;;  %s45_s18 = sshll.u32 %s1890_s17, 4  ;;  %s23_s16 = int_to_ptr.vmem [resolvable:$true] %s22_s16  ;;  %s46_s18 = int_to_ptr.vmem [resolvable:$true] %s45_s18 }
  0x16   :  { %s1790_s21 = scalar_lea.hbm %s2030_s0, 128 }
  0x17   :  { %p1791_p8 = scmp.ne.s32.totalorder %s2030_s0, %s1790_s21  ;;  %p1794_p9 = scmp.lt.u32.totalorder %s1790_s21, %s2030_s0 }
  0x19   :  { %p1796_p10 = pnand %p1794_p9, %p1791_p8 }
  0x1b   :  { %1799 = shalt.err (!%p1796_p10)
}
  0x1c   :  { %s1800_s1 = scalar_lea.vmem %s23_s16, 128  ;;  %p1805_p12 = scmp.lt.s32.totalorder %s23_s16, %s23_s16 }
  0x1d   :  { %p1801_p11 = scmp.ne.s32.totalorder %s23_s16, %s1800_s1  ;;  %p1806_p13 = scmp.lt.s32.totalorder %s1800_s1, %s1800_s1 }
  0x1f   :  { %p1807_p0 = por %p1806_p13, %p1805_p12 }
  0x21   :  { %p1808_p1 = pnand %p1807_p0, %p1801_p11 }
  0x23   :  { %1811 = shalt.err (!%p1808_p1)
}
  0x24   :  { %25 = dma.hbm_to_vmem [thread:$0]  %s2030_s0, 128, %s23_s16, [#allocation3]  }
  0x25   :  { %s1812_s30 = scalar_lea.hbm %s2033_s3, 12288 }
  0x26   :  { %p1813_p2 = scmp.ne.s32.totalorder %s2033_s3, %s1812_s30  ;;  %p1816_p3 = scmp.lt.u32.totalorder %s1812_s30, %s2033_s3 }
  0x28   :  { %p1818_p4 = pnand %p1816_p3, %p1813_p2 }
  0x2a   :  { %1821 = shalt.err (!%p1818_p4)
}
  0x2b   :  { %s1822_s12 = scalar_lea.vmem %s46_s18, 12288  ;;  %p1827_p6 = scmp.lt.s32.totalorder %s46_s18, %s46_s18 }
  0x2c   :  { %p1823_p5 = scmp.ne.s32.totalorder %s46_s18, %s1822_s12  ;;  %p1828_p7 = scmp.lt.s32.totalorder %s1822_s12, %s1822_s12 }
  0x2e   :  { %p1829_p8 = por %p1828_p7, %p1827_p6 }
  0x30   :  { %p1830_p9 = pnand %p1829_p8, %p1823_p5 }
  0x32   :  { %1833 = shalt.err (!%p1830_p9)
}
  0x33   :  { %s1891_s0 = smov 256   ;;  %s1892_s13 = smov 16  }
  0x34   :  { %51 = dma.hbm_to_vmem [thread:$0]  %s2033_s3, 12288, %s46_s18, [#allocation6], %s1891_s0, %s1891_s0, %s1892_s13  }
  0x35   :  { %s1893_s16 = smov [#allocation8]   ;;  %s1834_s21 = scalar_lea.hbm %s2035_s5, 4096 }
  0x36   :  { %s59_s17 = sshll.u32 %s1893_s16, 4  ;;  %p1835_p10 = scmp.ne.s32.totalorder %s2035_s5, %s1834_s21  ;;  %s60_s17 = int_to_ptr.vmem [resolvable:$true] %s59_s17 }
  0x37   :  { %p1838_p11 = scmp.lt.u32.totalorder %s1834_s21, %s2035_s5 }
  0x39   :  { %p1840_p12 = pnand %p1838_p11, %p1835_p10 }
  0x3b   :  { %1843 = shalt.err (!%p1840_p12)
}
  0x3c   :  { %s1844_s1 = scalar_lea.vmem %s60_s17, 4096  ;;  %p1849_p0 = scmp.lt.s32.totalorder %s60_s17, %s60_s17 }
  0x3d   :  { %p1845_p13 = scmp.ne.s32.totalorder %s60_s17, %s1844_s1  ;;  %p1850_p1 = scmp.lt.s32.totalorder %s1844_s1, %s1844_s1 }
  0x3f   :  { %p1851_p2 = por %p1850_p1, %p1849_p0 }
  0x41   :  { %p1852_p3 = pnand %p1851_p2, %p1845_p13 }
  0x43   :  { %1855 = shalt.err (!%p1852_p3)
}
  0x44   :  { %s1894_s3 = smov 64   ;;  %s1895_s18 = smov 4  }
  0x45   :  { %65 = dma.hbm_to_vmem [thread:$0]  %s2035_s5, 4096, %s60_s17, [#allocation9], %s1894_s3, %s1894_s3, %s1895_s18  }
  0x46   :  { %1878 = dma.done.wait [#allocation3], 128  }
  0x47   :  { %1879 = vsyncadd [#allocation3], 4294967168 }
  0x48   :  { %1880 = dma.done.wait [#allocation6], 13056  }
  0x49   :  { %1881 = vsyncadd [#allocation6], 4294954240 }
  0x4a   :  { %1882 = dma.done.wait [#allocation9], 4096  }
  0x4b   :  { %1883 = vsyncadd [#allocation9], 4294963200  ;;  %v1896_v0 = vmov 0   ;;  %v1897_v1 = vmov 0.0   ;;  %vm1898_vm0 = vmmov 0   ;;  %v81_v6 = vld [vmem:[#allocation2] sm:$0xff] }
  0x4c   :  { %176 = vmatprep.mubr.bf16.mxu0 %v1896_v0  ;;  %1548 = vmatprep.subr.bf16.mxu1 %v1897_v1  ;;  %v1582_v2 = vld [vmem:[#allocation5 + $0x4] ss:$12 sps:$4 sm:$0xff]   ;;  %v1584_v3 = vld [vmem:[#allocation5] ss:$12 sps:$4 sm:$0xff]   ;;  %v1585_v4 = vld [vmem:[#allocation5 + $0x1c] ss:$12 sps:$4 sm:$0xff]   ;;  %v82_v9 = vpack.c.bf16 %v81_v6, %v81_v6 }
  0x4d   :  { %1552 = vmatprep.mubr.msk.bf16.mxu1 %vm1898_vm0, %v1897_v1  ;;  %144 = vmatprep.subr.bf16.mxu0 %v1582_v2  ;;  %v1587_v5 = vld [vmem:[#allocation5 + $0x18] ss:$12 sps:$4 sm:$0xff]   ;;  %v1588_v7 = vld [vmem:[#allocation5 + $0x8] ss:$12 sps:$4 sm:$0xff]   ;;  %v1589_v8 = vld [vmem:[#allocation5 + $0x20] ss:$12 sps:$4 sm:$0xff]  }
  0x4e   :  { %145 = vmatpush1.bf16.msra.mxu0 %v1584_v3  ;;  %1549 = vmatpush3.bf16.msra.mxu1 %v1588_v7  ;;  %v1592_v10 = vld [vmem:[#allocation7 + $0x4] ss:$16 sps:$4 sm:$0xff]   ;;  %vm140_vm1 = vcmask 261120   ;;  %v1590_v11 = vld [vmem:[#allocation7] ss:$16 sps:$4 sm:$0xff]   ;;  %s1899_s8 = smov [#allocation10]  }
  0x4f   :  { %146 = vmatprep.subr.bf16.mxu0 %v1585_v4  ;;  %1550 = vmatprep.subr.bf16.mxu1 %v1897_v1  ;;  %v1595_v12 = vld [vmem:[#allocation7 + $0xc] ss:$16 sps:$4 sm:$0xff]   ;;  %v1598_v13 = vld [vmem:[#allocation7 + $0x24] ss:$16 sps:$4 sm:$0xff]   ;;  %v1593_v14 = vld [vmem:[#allocation7 + $0x8] ss:$16 sps:$4 sm:$0xff]  }
  0x50   :  { %v1601_v15 = vld [vmem:[#allocation7 + $0x2c] ss:$16 sps:$4 sm:$0xff]   ;;  %v1596_v16 = vld [vmem:[#allocation7 + $0x20] ss:$16 sps:$4 sm:$0xff]   ;;  %v1604_v17 = vld [vmem:[#allocation7 + $0x44] ss:$16 sps:$4 sm:$0xff]  }
  0x51   :  { %v1599_v18 = vld [vmem:[#allocation7 + $0x28] ss:$16 sps:$4 sm:$0xff]   ;;  %v1607_v19 = vld [vmem:[#allocation7 + $0x4c] ss:$16 sps:$4 sm:$0xff]   ;;  %v1602_v20 = vld [vmem:[#allocation7 + $0x40] ss:$16 sps:$4 sm:$0xff]  }
  0x52   :  { %147 = vmatpush1.bf16.msra.mxu0 %v1587_v5  ;;  %1551 = vmatpush3.bf16.msra.mxu1 %v1589_v8  ;;  %v1610_v21 = vld [vmem:[#allocation7 + $0x64] ss:$16 sps:$4 sm:$0xff]   ;;  %v1605_v22 = vld [vmem:[#allocation7 + $0x48] ss:$16 sps:$4 sm:$0xff]   ;;  %v1613_v23 = vld [vmem:[#allocation7 + $0x6c] ss:$16 sps:$4 sm:$0xff]  }
  0x53   :  { %829 = vmatprep.subr.bf16.mxu0 %v1592_v10  ;;  %911 = vmatprep.subr.bf16.mxu1 %v1595_v12  ;;  %v1608_v24 = vld [vmem:[#allocation7 + $0x60] ss:$16 sps:$4 sm:$0xff]   ;;  %v1616_v25 = vld [vmem:[#allocation7 + $0x84] ss:$16 sps:$4 sm:$0xff]   ;;  %v1611_v26 = vld [vmem:[#allocation7 + $0x68] ss:$16 sps:$4 sm:$0xff]  }
  0x54   :  { %v1619_v27 = vld [vmem:[#allocation7 + $0x8c] ss:$16 sps:$4 sm:$0xff]   ;;  %v1614_v28 = vld [vmem:[#allocation7 + $0x80] ss:$16 sps:$4 sm:$0xff]   ;;  %v1622_v29 = vld [vmem:[#allocation7 + $0xa4] ss:$16 sps:$4 sm:$0xff]  }
  0x55   :  { %1370 = vmatmul.mubr.msk.bf16.vlgmr.msra.gmra.mrb[0].mxu0 %vm140_vm1, %v82_v9  ;;  %1553 = vmatmul.mubr.msk.bf16.vlgmr.msra.gmra.mrb[0].mxu1 %vm140_vm1, %v82_v9  ;;  %v1617_v30 = vld [vmem:[#allocation7 + $0x88] ss:$16 sps:$4 sm:$0xff]   ;;  %v1625_v31 = vld [vmem:[#allocation7 + $0xac] ss:$16 sps:$4 sm:$0xff]   ;;  %v1620_v32 = vld [vmem:[#allocation7 + $0xa0] ss:$16 sps:$4 sm:$0xff]  }
  0x56   :  { %830 = vmatpush1.bf16.msra.mxu0 %v1590_v11  ;;  %912 = vmatpush1.bf16.msra.mxu1 %v1593_v14  ;;  %v1628_v33 = vld [vmem:[#allocation7 + $0xc4] ss:$16 sps:$4 sm:$0xff]   ;;  %v1623_v34 = vld [vmem:[#allocation7 + $0xa8] ss:$16 sps:$4 sm:$0xff]   ;;  %v1631_v35 = vld [vmem:[#allocation7 + $0xcc] ss:$16 sps:$4 sm:$0xff]  }
  0x57   :  { %831 = vmatprep.subr.bf16.mxu0 %v1598_v13  ;;  %913 = vmatprep.subr.bf16.mxu1 %v1601_v15  ;;  %v1626_v36 = vld [vmem:[#allocation7 + $0xc0] ss:$16 sps:$4 sm:$0xff]   ;;  %v1634_v37 = vld [vmem:[#allocation7 + $0xe4] ss:$16 sps:$4 sm:$0xff]   ;;  %v1629_v38 = vld [vmem:[#allocation7 + $0xc8] ss:$16 sps:$4 sm:$0xff]   ;;  %v93_v13 = vlaneseq }
  0x58   :  { %v1637_v39 = vld [vmem:[#allocation7 + $0xec] ss:$16 sps:$4 sm:$0xff]   ;;  %v1632_v40 = vld [vmem:[#allocation7 + $0xe0] ss:$16 sps:$4 sm:$0xff]   ;;  %v1640_v41 = vld [vmem:[#allocation7 + $0x104] ss:$16 sps:$4 sm:$0xff]  }
  0x59   :  { %v1635_v42 = vld [vmem:[#allocation7 + $0xe8] ss:$16 sps:$4 sm:$0xff]   ;;  %v1643_v43 = vld [vmem:[#allocation7 + $0x10c] ss:$16 sps:$4 sm:$0xff]   ;;  %v1638_v44 = vld [vmem:[#allocation7 + $0x100] ss:$16 sps:$4 sm:$0xff]  }
  0x5a   :  { %832 = vmatpush1.bf16.msra.mxu0 %v1596_v16  ;;  %914 = vmatpush1.bf16.msra.mxu1 %v1599_v18  ;;  %v1641_v45 = vld [vmem:[#allocation7 + $0x108] ss:$16 sps:$4 sm:$0xff]   ;;  %v1646_v46 = vld [vmem:[#allocation7 + $0x124] ss:$16 sps:$4 sm:$0xff]   ;;  %v1644_v47 = vld [vmem:[#allocation7 + $0x120] ss:$16 sps:$4 sm:$0xff]  }
  0x5b   :  { %833 = vmatprep.subr.bf16.mxu0 %v1604_v17  ;;  %915 = vmatprep.subr.bf16.mxu1 %v1607_v19  ;;  %v1649_v48 = vld [vmem:[#allocation7 + $0x12c] ss:$16 sps:$4 sm:$0xff]   ;;  %v1652_v49 = vld [vmem:[#allocation7 + $0x144] ss:$16 sps:$4 sm:$0xff]   ;;  %v1647_v50 = vld [vmem:[#allocation7 + $0x128] ss:$16 sps:$4 sm:$0xff]  }
  0x5c   :  { %v1655_v51 = vld [vmem:[#allocation7 + $0x14c] ss:$16 sps:$4 sm:$0xff]   ;;  %v1650_v52 = vld [vmem:[#allocation7 + $0x140] ss:$16 sps:$4 sm:$0xff]   ;;  %v1658_v53 = vld [vmem:[#allocation7 + $0x164] ss:$16 sps:$4 sm:$0xff]  }
  0x5d   :  { %v1653_v54 = vld [vmem:[#allocation7 + $0x148] ss:$16 sps:$4 sm:$0xff]   ;;  %v1661_v55 = vld [vmem:[#allocation7 + $0x16c] ss:$16 sps:$4 sm:$0xff]   ;;  %v1656_v56 = vld [vmem:[#allocation7 + $0x160] ss:$16 sps:$4 sm:$0xff]  }
  0x5e   :  { %834 = vmatpush1.bf16.msra.mxu0 %v1602_v20  ;;  %916 = vmatpush1.bf16.msra.mxu1 %v1605_v22  ;;  %v1664_v57 = vld [vmem:[#allocation7 + $0x184] ss:$16 sps:$4 sm:$0xff]   ;;  %v1659_v58 = vld [vmem:[#allocation7 + $0x168] ss:$16 sps:$4 sm:$0xff]   ;;  %v1667_v59 = vld [vmem:[#allocation7 + $0x18c] ss:$16 sps:$4 sm:$0xff]  }
  0x5f   :  { %835 = vmatprep.subr.bf16.mxu0 %v1610_v21  ;;  %917 = vmatprep.subr.bf16.mxu1 %v1613_v23  ;;  %v1662_v60 = vld [vmem:[#allocation7 + $0x180] ss:$16 sps:$4 sm:$0xff]   ;;  %v1670_v61 = vld [vmem:[#allocation7 + $0x1a4] ss:$16 sps:$4 sm:$0xff]   ;;  %v1665_v62 = vld [vmem:[#allocation7 + $0x188] ss:$16 sps:$4 sm:$0xff]  }
  0x60   :  { %v1673_v63 = vld [vmem:[#allocation7 + $0x1ac] ss:$16 sps:$4 sm:$0xff]   ;;  %v1668_v1 = vld [vmem:[#allocation7 + $0x1a0] ss:$16 sps:$4 sm:$0xff]   ;;  %v1671_v2 = vld [vmem:[#allocation7 + $0x1a8] ss:$16 sps:$4 sm:$0xff]  }
  0x61   :  { %v1676_v3 = vld [vmem:[#allocation7 + $0x1c4] ss:$16 sps:$4 sm:$0xff]   ;;  %v1679_v4 = vld [vmem:[#allocation7 + $0x1cc] ss:$16 sps:$4 sm:$0xff]   ;;  %v1674_v5 = vld [vmem:[#allocation7 + $0x1c0] ss:$16 sps:$4 sm:$0xff]  }
  0x62   :  { %836 = vmatpush1.bf16.msra.mxu0 %v1608_v24  ;;  %918 = vmatpush1.bf16.msra.mxu1 %v1611_v26  ;;  %v1677_v6 = vld [vmem:[#allocation7 + $0x1c8] ss:$16 sps:$4 sm:$0xff]   ;;  %v1682_v7 = vld [vmem:[#allocation7 + $0x1e4] ss:$16 sps:$4 sm:$0xff]   ;;  %v1685_v8 = vld [vmem:[#allocation7 + $0x1ec] ss:$16 sps:$4 sm:$0xff]  }
  0x63   :  { %837 = vmatprep.subr.bf16.mxu0 %v1616_v25  ;;  %919 = vmatprep.subr.bf16.mxu1 %v1619_v27  ;;  %v1680_v9 = vld [vmem:[#allocation7 + $0x1e0] ss:$16 sps:$4 sm:$0xff]   ;;  %v1683_v10 = vld [vmem:[#allocation7 + $0x1e8] ss:$16 sps:$4 sm:$0xff]   ;;  %v1688_v11 = vld [vmem:[#allocation7 + $0x204] ss:$16 sps:$4 sm:$0xff]  }
  0x64   :  { %v1691_v12 = vld [vmem:[#allocation7 + $0x20c] ss:$16 sps:$4 sm:$0xff]   ;;  %v1989_v14 = vshrl.u32 %v93_v13, 7  ;;  %v91_v16 = vld [vmem:[%s2032_s2] sm:$0x7]  ;;  %v1742_v13 = vld [vmem:[#allocation8 + $0x50] sm:$0xff]  }
  0x65   :  { %s1353_s9 = sshll.u32 %s1899_s8, 4  ;;  %s1354_s9 = int_to_ptr.vmem [resolvable:$true] %s1353_s9 }
  0x66   :  { %838 = vmatpush1.bf16.msra.mxu0 %v1614_v28  ;;  %920 = vmatpush1.bf16.msra.mxu1 %v1617_v30  ;;  %v95_v15 = vsub.s32 0, %v1989_v14  ;;  %v99_v17 = vsub.s32 1, %v1989_v14  ;;  %s1856_s10 = scalar_lea.vmem %s1354_s9, 128  ;;  %p1861_p5 = scmp.lt.s32.totalorder %s1354_s9, %s1354_s9 }
  0x67   :  { %839 = vmatprep.subr.bf16.mxu0 %v1622_v29  ;;  %921 = vmatprep.subr.bf16.mxu1 %v1625_v31  ;;  %p1857_p4 = scmp.ne.s32.totalorder %s1354_s9, %s1856_s10  ;;  %p1862_p6 = scmp.lt.s32.totalorder %s1856_s10, %s1856_s10 }
  0x68   :  { %v96_v18 = vrot.slane %v91_v16, %v95_v15  ;;  %v100_v19 = vrot.slane %v91_v16, %v99_v17 }
  0x69   :  { %p1863_p7 = por %p1862_p6, %p1861_p5 }
  0x6a   :  { %840 = vmatpush1.bf16.msra.mxu0 %v1620_v32  ;;  %922 = vmatpush1.bf16.msra.mxu1 %v1623_v34  ;;  %v1689_v34 = vld [vmem:[#allocation7 + $0x208] ss:$16 sps:$4 sm:$0xff]  }
  0x6b   :  { %841 = vmatprep.subr.bf16.mxu0 %v1628_v33  ;;  %923 = vmatprep.subr.bf16.mxu1 %v1631_v35  ;;  %v1686_v33 = vld [vmem:[#allocation7 + $0x200] ss:$16 sps:$4 sm:$0xff]   ;;  %p1864_p8 = pnand %p1863_p7, %p1857_p4 }
  0x6e   :  { %842 = vmatpush1.bf16.msra.mxu0 %v1626_v36  ;;  %924 = vmatpush1.bf16.msra.mxu1 %v1629_v38  ;;  %v1694_v36 = vld [vmem:[#allocation7 + $0x224] ss:$16 sps:$4 sm:$0xff]   ;;  %v1692_v38 = vld [vmem:[#allocation7 + $0x220] ss:$16 sps:$4 sm:$0xff]  }
  0x6f   :  { %843 = vmatprep.subr.bf16.mxu0 %v1634_v37  ;;  %925 = vmatprep.subr.bf16.mxu1 %v1637_v39  ;;  %v1697_v37 = vld [vmem:[#allocation7 + $0x22c] ss:$16 sps:$4 sm:$0xff]   ;;  %v1695_v39 = vld [vmem:[#allocation7 + $0x228] ss:$16 sps:$4 sm:$0xff]  }
  0x72   :  { %844 = vmatpush1.bf16.msra.mxu0 %v1632_v40  ;;  %926 = vmatpush1.bf16.msra.mxu1 %v1635_v42  ;;  %v1700_v40 = vld [vmem:[#allocation7 + $0x244] ss:$16 sps:$4 sm:$0xff]   ;;  %v1698_v42 = vld [vmem:[#allocation7 + $0x240] ss:$16 sps:$4 sm:$0xff]  }
  0x73   :  { %845 = vmatprep.subr.bf16.mxu0 %v1640_v41  ;;  %927 = vmatprep.subr.bf16.mxu1 %v1643_v43  ;;  %v1703_v41 = vld [vmem:[#allocation7 + $0x24c] ss:$16 sps:$4 sm:$0xff]   ;;  %v1701_v43 = vld [vmem:[#allocation7 + $0x248] ss:$16 sps:$4 sm:$0xff]  }
  0x76   :  { %846 = vmatpush1.bf16.msra.mxu0 %v1638_v44  ;;  %928 = vmatpush1.bf16.msra.mxu1 %v1641_v45  ;;  %v1706_v44 = vld [vmem:[#allocation7 + $0x264] ss:$16 sps:$4 sm:$0xff]   ;;  %v1709_v45 = vld [vmem:[#allocation7 + $0x26c] ss:$16 sps:$4 sm:$0xff]  }
  0x77   :  { %847 = vmatprep.subr.bf16.mxu0 %v1646_v46  ;;  %929 = vmatprep.subr.bf16.mxu1 %v1649_v48  ;;  %v1704_v46 = vld [vmem:[#allocation7 + $0x260] ss:$16 sps:$4 sm:$0xff]   ;;  %v1712_v48 = vld [vmem:[#allocation7 + $0x284] ss:$16 sps:$4 sm:$0xff]  }
  0x7a   :  { %848 = vmatpush1.bf16.msra.mxu0 %v1644_v47  ;;  %930 = vmatpush1.bf16.msra.mxu1 %v1647_v50  ;;  %v1707_v47 = vld [vmem:[#allocation7 + $0x268] ss:$16 sps:$4 sm:$0xff]   ;;  %v103_v50 = vsub.s32 2, %v1989_v14 }
  0x7b   :  { %849 = vmatprep.subr.bf16.mxu0 %v1652_v49  ;;  %931 = vmatprep.subr.bf16.mxu1 %v1655_v51  ;;  %v1715_v49 = vld [vmem:[#allocation7 + $0x28c] ss:$16 sps:$4 sm:$0xff]   ;;  %v1713_v51 = vld [vmem:[#allocation7 + $0x288] ss:$16 sps:$4 sm:$0xff]  }
  0x7e   :  { %850 = vmatpush1.bf16.msra.mxu0 %v1650_v52  ;;  %932 = vmatpush1.bf16.msra.mxu1 %v1653_v54  ;;  %v1718_v52 = vld [vmem:[#allocation7 + $0x2a4] ss:$16 sps:$4 sm:$0xff]   ;;  %v104_v54 = vrot.slane %v91_v16, %v103_v50 }
  0x7f   :  { %851 = vmatprep.subr.bf16.mxu0 %v1658_v53  ;;  %933 = vmatprep.subr.bf16.mxu1 %v1661_v55  ;;  %v1721_v53 = vld [vmem:[#allocation7 + $0x2ac] ss:$16 sps:$4 sm:$0xff]   ;;  %v1716_v55 = vld [vmem:[#allocation7 + $0x2a0] ss:$16 sps:$4 sm:$0xff]  }
  0x80   :  { %v1743_v16 = vld [vmem:[#allocation8 + $0xd0] sm:$0xff]  }
  0x82   :  { %852 = vmatpush1.bf16.msra.mxu0 %v1656_v56  ;;  %934 = vmatpush1.bf16.msra.mxu1 %v1659_v58  ;;  %v1719_v56 = vld [vmem:[#allocation7 + $0x2a8] ss:$16 sps:$4 sm:$0xff]   ;;  %v1727_v58 = vld [vmem:[#allocation7 + $0x2cc] ss:$16 sps:$4 sm:$0xff]  }
  0x83   :  { %853 = vmatprep.subr.bf16.mxu0 %v1664_v57  ;;  %935 = vmatprep.subr.bf16.mxu1 %v1667_v59  ;;  %v1724_v57 = vld [vmem:[#allocation7 + $0x2c4] ss:$16 sps:$4 sm:$0xff]  }
  0x86   :  { %854 = vmatpush1.bf16.msra.mxu0 %v1662_v60  ;;  %936 = vmatpush1.bf16.msra.mxu1 %v1665_v62  ;;  %v1722_v60 = vld [vmem:[#allocation7 + $0x2c0] ss:$16 sps:$4 sm:$0xff]   ;;  %v1730_v62 = vld [vmem:[#allocation7 + $0x2e4] ss:$16 sps:$4 sm:$0xff]  }
  0x87   :  { %855 = vmatprep.subr.bf16.mxu0 %v1670_v61  ;;  %937 = vmatprep.subr.bf16.mxu1 %v1673_v63  ;;  %v1725_v61 = vld [vmem:[#allocation7 + $0x2c8] ss:$16 sps:$4 sm:$0xff]   ;;  %v1733_v63 = vld [vmem:[#allocation7 + $0x2ec] ss:$16 sps:$4 sm:$0xff]  }
  0x8a   :  { %856 = vmatpush1.bf16.msra.mxu0 %v1668_v1  ;;  %938 = vmatpush1.bf16.msra.mxu1 %v1671_v2  ;;  %v1728_v2 = vld [vmem:[#allocation7 + $0x2e0] ss:$16 sps:$4 sm:$0xff]  }
  0x8b   :  { %857 = vmatprep.subr.bf16.mxu0 %v1676_v3  ;;  %939 = vmatprep.subr.bf16.mxu1 %v1679_v4  ;;  %v1731_v3 = vld [vmem:[#allocation7 + $0x2e8] ss:$16 sps:$4 sm:$0xff]   ;;  %v1734_v4 = vld [vmem:[#allocation8 + $0x40] sm:$0xff]  }
  0x8e   :  { %858 = vmatpush1.bf16.msra.mxu0 %v1674_v5  ;;  %940 = vmatpush1.bf16.msra.mxu1 %v1677_v6  ;;  %v1735_v5 = vld [vmem:[#allocation8 + $0xc0] sm:$0xff]  }
  0x8f   :  { %859 = vmatprep.subr.bf16.mxu0 %v1682_v7  ;;  %941 = vmatprep.subr.bf16.mxu1 %v1685_v8  ;;  %v1736_v7 = vld [vmem:[#allocation8] sm:$0xff]  }
  0x90   :  { %v1737_v8 = vld [vmem:[#allocation8 + $0x80] sm:$0xff]  }
  0x92   :  { %860 = vmatpush1.bf16.msra.mxu0 %v1680_v9  ;;  %942 = vmatpush1.bf16.msra.mxu1 %v1683_v10  ;;  %v1738_v9 = vld [vmem:[#allocation8 + $0x48] sm:$0xff]  }
  0x93   :  { %870 = vmatprep.subr.bf16.mxu0 %v1688_v11  ;;  %952 = vmatprep.subr.bf16.mxu1 %v1691_v12  ;;  %v1739_v10 = vld [vmem:[#allocation8 + $0xc8] sm:$0xff]  }
  0x94   :  { %v1740_v11 = vld [vmem:[#allocation8 + $0x8] sm:$0xff]  }
  0x95   :  { %v1741_v12 = vld [vmem:[#allocation8 + $0x88] sm:$0xff]  }
 0x128   :  { %v178_v20 = vpop.f32.mrb[0].mxu0  ;;  %v219_v25 = vpop.f32.mrb[0].mxu1 }
 0x129   :  { %v179_v21 = vadd.f32 %v178_v20, %v96_v18  ;;  %v180_v22 = vpop.f32.mrb[1].mxu0  ;;  %v1554_v28 = vpop.f32.mrb[1].mxu1  ;;  %v220_v59 = vadd.f32 %v219_v25, %v104_v54  ;;  %v1744_v18 = vld [vmem:[#allocation8 + $0x10] sm:$0xff]   ;;  %v1746_v20 = vld [vmem:[#allocation8 + $0x58] sm:$0xff]   ;;  %v1751_v25 = vld [vmem:[#allocation8 + $0xe0] sm:$0xff]  }
 0x12a   :  { %v181_v23 = vadd.f32 %v180_v22, %v100_v19  ;;  %v182_v24 = vpop.f32.mrb[2].mxu0  ;;  %v222_v30 = vpop.f32.mrb[2].mxu1  ;;  %v1745_v19 = vld [vmem:[#allocation8 + $0x90] sm:$0xff]   ;;  %v1748_v22 = vld [vmem:[#allocation8 + $0x18] sm:$0xff]   ;;  %v1754_v28 = vld [vmem:[#allocation8 + $0x68] sm:$0xff]  }
 0x12b   :  { %v225_v26 = vmax.f32 %v179_v21, 0.0  ;;  %v183_v27 = vpop.f32.mrb[3].mxu0  ;;  %v1555_v31 = vpop.f32.mrb[3].mxu1  ;;  %v227_v1 = vmax.f32 %v220_v59, 0.0  ;;  %v1747_v21 = vld [vmem:[#allocation8 + $0xd8] sm:$0xff]   ;;  %v1750_v24 = vld [vmem:[#allocation8 + $0x60] sm:$0xff]  }
 0x12c   :  { %v226_v29 = vmax.f32 %v181_v23, 0.0  ;;  %v1749_v23 = vld [vmem:[#allocation8 + $0x98] sm:$0xff]   ;;  %v1753_v27 = vld [vmem:[#allocation8 + $0xa0] sm:$0xff]   ;;  %v1756_v30 = vld [vmem:[#allocation8 + $0x28] sm:$0xff]  }
 0x12d   :  { %v228_v35 = vpack.c.bf16 %v225_v26, %v225_v26  ;;  %v230_v6 = vpack.c.bf16 %v227_v1, %v227_v1  ;;  %v1752_v26 = vld [vmem:[#allocation8 + $0x20] sm:$0xff]   ;;  %v1757_v31 = vld [vmem:[#allocation8 + $0xa8] sm:$0xff]  }
 0x12e   :  { %v229_v32 = vpack.c.bf16 %v226_v29, %v226_v29  ;;  %v1755_v29 = vld [vmem:[#allocation8 + $0xe8] sm:$0xff]  }
 0x12f   :  { %v1468_v1 = vld [vmem:[%s2036_s6] ss:$0 sm:$0xff] }
 0x130   :  { %861 = vmatprep.mubr.bf16.mxu0 %v229_v32  ;;  %943 = vmatprep.mubr.bf16.mxu1 %v229_v32  ;;  %v1758_v32 = vld [vmem:[#allocation8 + $0x70] sm:$0xff]  }
 0x131   :  { %862 = vmatmul.mubr.bf16.vlgmr.msra.gmra.mrb[4].mxu0 %v228_v35  ;;  %944 = vmatmul.mubr.bf16.vlgmr.msra.gmra.mrb[4].mxu1 %v228_v35  ;;  %v1761_v35 = vld [vmem:[#allocation8 + $0xb0] sm:$0xff]  }
 0x132   :  { %871 = vmatpush1.bf16.msra.mxu0 %v1686_v33  ;;  %953 = vmatpush1.bf16.msra.mxu1 %v1689_v34  ;;  %v1759_v33 = vld [vmem:[#allocation8 + $0xf0] sm:$0xff]  }
 0x133   :  { %872 = vmatprep.subr.bf16.mxu0 %v1694_v36  ;;  %954 = vmatprep.subr.bf16.mxu1 %v1697_v37  ;;  %v1760_v34 = vld [vmem:[#allocation8 + $0x30] sm:$0xff]   ;;  %v1762_v36 = vld [vmem:[#allocation8 + $0x78] sm:$0xff]  }
 0x134   :  { %902 = vmatprep.mubr.bf16.mxu0 %v1896_v0  ;;  %984 = vmatprep.mubr.bf16.mxu1 %v1896_v0  ;;  %v1710_v0 = vld [vmem:[#allocation7 + $0x280] ss:$16 sps:$4 sm:$0xff]   ;;  %v1763_v37 = vld [vmem:[#allocation8 + $0xf8] sm:$0xff]  }
 0x136   :  { %873 = vmatpush1.bf16.msra.mxu0 %v1692_v38  ;;  %955 = vmatpush1.bf16.msra.mxu1 %v1695_v39  ;;  %v1764_v38 = vld [vmem:[#allocation8 + $0x38] sm:$0xff]  }
 0x137   :  { %874 = vmatprep.subr.bf16.mxu0 %v1700_v40  ;;  %956 = vmatprep.subr.bf16.mxu1 %v1703_v41  ;;  %v1765_v39 = vld [vmem:[#allocation8 + $0xb8] sm:$0xff]   ;;  %v327_v40 = vld [vmem:[%s2034_s4] sm:$0xf]  ;;  %v343_v41 = vsub.s32 3, %v1989_v14 }
 0x13a   :  { %875 = vmatpush1.bf16.msra.mxu0 %v1698_v42  ;;  %957 = vmatpush1.bf16.msra.mxu1 %v1701_v43  ;;  %v332_v42 = vrot.slane %v327_v40, %v95_v15  ;;  %v340_v43 = vrot.slane %v327_v40, %v103_v50 }
 0x13b   :  { %876 = vmatprep.subr.bf16.mxu0 %v1706_v44  ;;  %958 = vmatprep.subr.bf16.mxu1 %v1709_v45  ;;  %v336_v44 = vrot.slane %v327_v40, %v99_v17  ;;  %v344_v45 = vrot.slane %v327_v40, %v343_v41 }
 0x13e   :  { %877 = vmatpush1.bf16.msra.mxu0 %v1704_v46  ;;  %959 = vmatpush1.bf16.msra.mxu1 %v1707_v47 }
 0x13f   :  { %878 = vmatprep.subr.bf16.mxu0 %v1712_v48  ;;  %960 = vmatprep.subr.bf16.mxu1 %v1715_v49 }
 0x142   :  { %879 = vmatpush1.bf16.msra.mxu0 %v1710_v0  ;;  %961 = vmatpush1.bf16.msra.mxu1 %v1713_v51 }
 0x143   :  { %880 = vmatprep.subr.bf16.mxu0 %v1718_v52  ;;  %962 = vmatprep.subr.bf16.mxu1 %v1721_v53 }
 0x146   :  { %881 = vmatpush1.bf16.msra.mxu0 %v1716_v55  ;;  %963 = vmatpush1.bf16.msra.mxu1 %v1719_v56 }
 0x147   :  { %882 = vmatprep.subr.bf16.mxu0 %v1724_v57  ;;  %964 = vmatprep.subr.bf16.mxu1 %v1727_v58 }
 0x14a   :  { %883 = vmatpush1.bf16.msra.mxu0 %v1722_v60  ;;  %965 = vmatpush1.bf16.msra.mxu1 %v1725_v61 }
 0x14b   :  { %884 = vmatprep.subr.bf16.mxu0 %v1730_v62  ;;  %966 = vmatprep.subr.bf16.mxu1 %v1733_v63 }
 0x14e   :  { %885 = vmatpush1.bf16.msra.mxu0 %v1728_v2  ;;  %967 = vmatpush1.bf16.msra.mxu1 %v1731_v3 }
 0x14f   :  { %1504 = vmatprep.subr.bf16.mxu0 %v1734_v4  ;;  %1526 = vmatprep.subr.bf16.mxu1 %v1735_v5 }
 0x151   :  { %903 = vmatmul.mubr.bf16.vlgmr.msra.gmra.mrb[4].mxu0 %v230_v6  ;;  %985 = vmatmul.mubr.bf16.vlgmr.msra.gmra.mrb[4].mxu1 %v230_v6 }
 0x152   :  { %1505 = vmatpush3.bf16.msra.mxu0 %v1736_v7  ;;  %1527 = vmatpush3.bf16.msra.mxu1 %v1737_v8 }
 0x153   :  { %1506 = vmatprep.subr.bf16.mxu0 %v1738_v9  ;;  %1528 = vmatprep.subr.bf16.mxu1 %v1739_v10 }
 0x156   :  { %1507 = vmatpush3.bf16.msra.mxu0 %v1740_v11  ;;  %1529 = vmatpush3.bf16.msra.mxu1 %v1741_v12 }
 0x157   :  { %1508 = vmatprep.subr.bf16.mxu0 %v1742_v13  ;;  %1530 = vmatprep.subr.bf16.mxu1 %v1743_v16 }
 0x15a   :  { %1509 = vmatpush3.bf16.msra.mxu0 %v1744_v18  ;;  %1531 = vmatpush3.bf16.msra.mxu1 %v1745_v19 }
 0x15b   :  { %1510 = vmatprep.subr.bf16.mxu0 %v1746_v20  ;;  %1532 = vmatprep.subr.bf16.mxu1 %v1747_v21 }
 0x15e   :  { %1511 = vmatpush3.bf16.msra.mxu0 %v1748_v22  ;;  %1533 = vmatpush3.bf16.msra.mxu1 %v1749_v23 }
 0x15f   :  { %1512 = vmatprep.subr.bf16.mxu0 %v1750_v24  ;;  %1534 = vmatprep.subr.bf16.mxu1 %v1751_v25 }
 0x162   :  { %1513 = vmatpush3.bf16.msra.mxu0 %v1752_v26  ;;  %1535 = vmatpush3.bf16.msra.mxu1 %v1753_v27 }
 0x163   :  { %1514 = vmatprep.subr.bf16.mxu0 %v1754_v28  ;;  %1536 = vmatprep.subr.bf16.mxu1 %v1755_v29 }
 0x166   :  { %1515 = vmatpush3.bf16.msra.mxu0 %v1756_v30  ;;  %1537 = vmatpush3.bf16.msra.mxu1 %v1757_v31 }
 0x167   :  { %1516 = vmatprep.subr.bf16.mxu0 %v1758_v32  ;;  %1538 = vmatprep.subr.bf16.mxu1 %v1759_v33 }
 0x16a   :  { %1517 = vmatpush3.bf16.msra.mxu0 %v1760_v34  ;;  %1539 = vmatpush3.bf16.msra.mxu1 %v1761_v35 }
 0x16b   :  { %1518 = vmatprep.subr.bf16.mxu0 %v1762_v36  ;;  %1540 = vmatprep.subr.bf16.mxu1 %v1763_v37 }
 0x16e   :  { %1519 = vmatpush3.bf16.msra.mxu0 %v1764_v38  ;;  %1541 = vmatpush3.bf16.msra.mxu1 %v1765_v39 }
 0x224   :  { %v904_v46 = vpop.f32.mrb[4].mxu0  ;;  %v986_v47 = vpop.f32.mrb[4].mxu1 }
 0x225   :  { %v1556_v48 = vadd.f32 %v904_v46, %v332_v42  ;;  %v1558_v49 = vadd.f32 %v986_v47, %v340_v43  ;;  %v906_v0 = vpop.f32.mrb[5].mxu0  ;;  %v988_v51 = vpop.f32.mrb[5].mxu1 }
 0x226   :  { %v1557_v52 = vadd.f32 %v906_v0, %v336_v44  ;;  %v1559_v53 = vadd.f32 %v988_v51, %v344_v45  ;;  %v908_v54 = vpop.f32.mrb[6].mxu0  ;;  %v990_v55 = vpop.f32.mrb[6].mxu1 }
 0x227   :  { %v993_v56 = vmax.f32 %v1556_v48, 0.0  ;;  %v995_v57 = vmax.f32 %v1558_v49, 0.0  ;;  %v909_v15 = vpop.f32.mrb[7].mxu0  ;;  %v991_v58 = vpop.f32.mrb[7].mxu1 }
 0x228   :  { %v994_v59 = vmax.f32 %v1557_v52, 0.0  ;;  %v996_v50 = vmax.f32 %v1559_v53, 0.0 }
 0x229   :  { %v997_v17 = vpack.c.bf16 %v993_v56, %v993_v56  ;;  %v999_v61 = vpack.c.bf16 %v995_v57, %v995_v57 }
 0x22a   :  { %v998_v60 = vpack.c.bf16 %v994_v59, %v994_v59  ;;  %v1000_v14 = vpack.c.bf16 %v996_v50, %v996_v50 }
 0x22c   :  { %1296 = vmatprep.mubr.bf16.mxu0 %v998_v60  ;;  %1336 = vmatprep.mubr.bf16.mxu1 %v1000_v14 }
 0x22d   :  { %1297 = vmatmul.mubr.bf16.vlgmr.msra.gmra.mrb[8].mxu0 %v997_v17  ;;  %1337 = vmatmul.mubr.bf16.vlgmr.msra.gmra.mrb[8].mxu1 %v999_v61 }
 0x300   :  { %v1520_v62 = vpop.f32.mrb[8].mxu0  ;;  %v1542_v63 = vpop.f32.mrb[8].mxu1 }
 0x301   :  { %v1521_v2 = vpop.f32.mrb[9].mxu0  ;;  %v1543_v3 = vpop.f32.mrb[9].mxu1 }
 0x302   :  { %v1522_v4 = vadd.f32 %v1521_v2, %v1520_v62  ;;  %v1544_v5 = vadd.f32 %v1543_v3, %v1542_v63  ;;  %v1523_v6 = vpop.f32.mrb[10].mxu0  ;;  %v1545_v7 = vpop.f32.mrb[10].mxu1 }
 0x303   :  { %v1524_v8 = vpop.f32.mrb[11].mxu0  ;;  %v1546_v9 = vpop.f32.mrb[11].mxu1 }
 0x304   :  { %v1299_v10 = vadd.f32 %v1522_v4, %v1468_v1 }
 0x306   :  { %v1339_v11 = vadd.f32 %v1544_v5, %v1299_v10 }
 0x308   :  { %1766 = vtanh.f32 %v1339_v11 }
 0x312   :  { %v1767_v12 = vpop.eup %1766 }
 0x313   :  { %v1345_v13 = vmul.f32 2.0, %v1767_v12 }
 0x315   :  { %1346 = vst [vmem:[#allocation10] sm:$0xff] %v1345_v13 }
 0x316   :  { %1867 = shalt.err (!%p1864_p8)
}
 0x317   :  { %s1868_s12 = scalar_lea.hbm %s2037_s7, 128 }
 0x318   :  { %p1869_p9 = scmp.ne.s32.totalorder %s2037_s7, %s1868_s12  ;;  %p1872_p10 = scmp.lt.u32.totalorder %s1868_s12, %s2037_s7 }
 0x31a   :  { %p1874_p11 = pnand %p1872_p10, %p1869_p9 }
 0x31c   :  { %1877 = shalt.err (!%p1874_p11)
}
 0x31d   :  { %1356 = dma.vmem_to_hbm [thread:$0]  %s1354_s9, 128, %s2037_s7, [#allocation4]  }
 0x31e   :  { %1884 = dma.done.wait [#allocation4], 128  }
 0x31f   :  { %1885 = vsyncadd [#allocation4], 4294967168 }
 0x320   :  { %1360 = vsyncpa [#allocation3], 1 }
 0x321   :  { %1361 = vsyncpa [#allocation6], 1 }
 0x322   :  { %1362 = vsyncpa [#allocation9], 1 }
 0x323   :  { %1363 = vsyncpa [#allocation4], 1 }

// kernel: tpu_custom_call.1
= control target key start
LH: loop header
LB: loop body
LE: loop exit
PB: predicated region body
PF: predicated region fallthrough
CT: control target
= control target key end

     0   :  { %12 = vsyncpa [#allocation3], 0  ;;  %s2030_s0 = inlined_call_operand.hbm [shape: f32[8,32], index: 0, kind: input, shape index: {}]   ;;  %s2031_s1 = inlined_call_operand.hbm [shape: bf16[32,384], index: 1, kind: input, shape index: {}]   ;;  %s2032_s2 = inlined_call_operand.vmem [shape: f32[1,384], index: 2, kind: input, shape index: {}]   ;;  %s2033_s3 = inlined_call_operand.hbm [shape: bf16[384,512], index: 3, kind: input, shape index: {}]   ;;  %s2034_s4 = inlined_call_operand.vmem [shape: f32[1,512], index: 4, kind: input, shape index: {}]   ;;  %s2035_s5 = inlined_call_operand.hbm [shape: bf16[512,128], index: 5, kind: input, shape index: {}]   ;;  %s2036_s6 = inlined_call_operand.vmem [shape: f32[1,128], index: 6, kind: input, shape index: {}]   ;;  %s2037_s7 = inlined_call_operand.hbm [shape: f32[8,128], index: 7, kind: output, shape index: {}]  }
   0x1   :  { %13 = vsyncpa [#allocation6], 0 }
   0x2   :  { %14 = vsyncpa [#allocation9], 0 }
   0x3   :  { %15 = vsyncpa [#allocation4], 0  ;;  %s1886_s24 = smov [#allocation5]   ;;  %s1768_s28 = scalar_lea.hbm %s2031_s1, 768 }
   0x4   :  { %s31_s25 = sshll.u32 %s1886_s24, 4  ;;  %p1769_p0 = scmp.ne.s32.totalorder %s2031_s1, %s1768_s28  ;;  %s32_s25 = int_to_ptr.vmem [resolvable:$true] %s31_s25 }
   0x5   :  { %p1772_p1 = scmp.lt.u32.totalorder %s1768_s28, %s2031_s1 }
   0x7   :  { %p1774_p2 = pnand %p1772_p1, %p1769_p0 }
   0x9   :  { %1777 = shalt.err (!%p1774_p2)
}
   0xa   :  { %s1778_s10 = scalar_lea.vmem %s32_s25, 768  ;;  %p1783_p4 = scmp.lt.s32.totalorder %s32_s25, %s32_s25 }
   0xb   :  { %p1779_p3 = scmp.ne.s32.totalorder %s32_s25, %s1778_s10  ;;  %p1784_p5 = scmp.lt.s32.totalorder %s1778_s10, %s1778_s10 }
   0xd   :  { %p1785_p6 = por %p1784_p5, %p1783_p4 }
   0xf   :  { %p1786_p7 = pnand %p1785_p6, %p1779_p3 }
  0x11   :  { %1789 = shalt.err (!%p1786_p7)
}
  0x12   :  { %s1887_s11 = smov 192   ;;  %s1888_s12 = smov 12  }
  0x13   :  { %37 = dma.hbm_to_vmem [thread:$0]  %s2031_s1, 768, %s32_s25, [#allocation6], %s1887_s11, %s1887_s11, %s1888_s12  }
  0x14   :  { %s1889_s15 = smov [#allocation2]   ;;  %s1890_s17 = smov [#allocation7]  }
  0x15   :  { %s22_s16 = sshll.u32 %s1889_s15, 4  ;;  %s45_s18 = sshll.u32 %s1890_s17, 4  ;;  %s23_s16 = int_to_ptr.vmem [resolvable:$true] %s22_s16  ;;  %s46_s18 = int_to_ptr.vmem [resolvable:$true] %s45_s18 }
  0x16   :  { %s1790_s21 = scalar_lea.hbm %s2030_s0, 128 }
  0x17   :  { %p1791_p8 = scmp.ne.s32.totalorder %s2030_s0, %s1790_s21  ;;  %p1794_p9 = scmp.lt.u32.totalorder %s1790_s21, %s2030_s0 }
  0x19   :  { %p1796_p10 = pnand %p1794_p9, %p1791_p8 }
  0x1b   :  { %1799 = shalt.err (!%p1796_p10)
}
  0x1c   :  { %s1800_s1 = scalar_lea.vmem %s23_s16, 128  ;;  %p1805_p12 = scmp.lt.s32.totalorder %s23_s16, %s23_s16 }
  0x1d   :  { %p1801_p11 = scmp.ne.s32.totalorder %s23_s16, %s1800_s1  ;;  %p1806_p13 = scmp.lt.s32.totalorder %s1800_s1, %s1800_s1 }
  0x1f   :  { %p1807_p0 = por %p1806_p13, %p1805_p12 }
  0x21   :  { %p1808_p1 = pnand %p1807_p0, %p1801_p11 }
  0x23   :  { %1811 = shalt.err (!%p1808_p1)
}
  0x24   :  { %25 = dma.hbm_to_vmem [thread:$0]  %s2030_s0, 128, %s23_s16, [#allocation3]  }
  0x25   :  { %s1812_s30 = scalar_lea.hbm %s2033_s3, 12288 }
  0x26   :  { %p1813_p2 = scmp.ne.s32.totalorder %s2033_s3, %s1812_s30  ;;  %p1816_p3 = scmp.lt.u32.totalorder %s1812_s30, %s2033_s3 }
  0x28   :  { %p1818_p4 = pnand %p1816_p3, %p1813_p2 }
  0x2a   :  { %1821 = shalt.err (!%p1818_p4)
}
  0x2b   :  { %s1822_s12 = scalar_lea.vmem %s46_s18, 12288  ;;  %p1827_p6 = scmp.lt.s32.totalorder %s46_s18, %s46_s18 }
  0x2c   :  { %p1823_p5 = scmp.ne.s32.totalorder %s46_s18, %s1822_s12  ;;  %p1828_p7 = scmp.lt.s32.totalorder %s1822_s12, %s1822_s12 }
  0x2e   :  { %p1829_p8 = por %p1828_p7, %p1827_p6 }
  0x30   :  { %p1830_p9 = pnand %p1829_p8, %p1823_p5 }
  0x32   :  { %1833 = shalt.err (!%p1830_p9)
}
  0x33   :  { %s1891_s0 = smov 256   ;;  %s1892_s13 = smov 16  }
  0x34   :  { %51 = dma.hbm_to_vmem [thread:$0]  %s2033_s3, 12288, %s46_s18, [#allocation6], %s1891_s0, %s1891_s0, %s1892_s13  }
  0x35   :  { %s1893_s16 = smov [#allocation8]   ;;  %s1834_s21 = scalar_lea.hbm %s2035_s5, 4096 }
  0x36   :  { %s59_s17 = sshll.u32 %s1893_s16, 4  ;;  %p1835_p10 = scmp.ne.s32.totalorder %s2035_s5, %s1834_s21  ;;  %s60_s17 = int_to_ptr.vmem [resolvable:$true] %s59_s17 }
  0x37   :  { %p1838_p11 = scmp.lt.u32.totalorder %s1834_s21, %s2035_s5 }
  0x39   :  { %p1840_p12 = pnand %p1838_p11, %p1835_p10 }
  0x3b   :  { %1843 = shalt.err (!%p1840_p12)
}
  0x3c   :  { %s1844_s1 = scalar_lea.vmem %s60_s17, 4096  ;;  %p1849_p0 = scmp.lt.s32.totalorder %s60_s17, %s60_s17 }
  0x3d   :  { %p1845_p13 = scmp.ne.s32.totalorder %s60_s17, %s1844_s1  ;;  %p1850_p1 = scmp.lt.s32.totalorder %s1844_s1, %s1844_s1 }
  0x3f   :  { %p1851_p2 = por %p1850_p1, %p1849_p0 }
  0x41   :  { %p1852_p3 = pnand %p1851_p2, %p1845_p13 }
  0x43   :  { %1855 = shalt.err (!%p1852_p3)
}
  0x44   :  { %s1894_s3 = smov 64   ;;  %s1895_s18 = smov 4  }
  0x45   :  { %65 = dma.hbm_to_vmem [thread:$0]  %s2035_s5, 4096, %s60_s17, [#allocation9], %s1894_s3, %s1894_s3, %s1895_s18  }
  0x46   :  { %1878 = dma.done.wait [#allocation3], 128  }
  0x47   :  { %1879 = vsyncadd [#allocation3], 4294967168 }
  0x48   :  { %1880 = dma.done.wait [#allocation6], 13056  }
  0x49   :  { %1881 = vsyncadd [#allocation6], 4294954240 }
  0x4a   :  { %1882 = dma.done.wait [#allocation9], 4096  }
  0x4b   :  { %1883 = vsyncadd [#allocation9], 4294963200  ;;  %v1896_v0 = vmov 0   ;;  %v1897_v1 = vmov 0.0   ;;  %vm1898_vm0 = vmmov 0   ;;  %v81_v6 = vld [vmem:[#allocation2] sm:$0xff] }
  0x4c   :  { %176 = vmatprep.mubr.bf16.mxu0 %v1896_v0  ;;  %1548 = vmatprep.subr.bf16.mxu1 %v1897_v1  ;;  %v1582_v2 = vld [vmem:[#allocation5 + $0x4] ss:$12 sps:$4 sm:$0xff]   ;;  %v1584_v3 = vld [vmem:[#allocation5] ss:$12 sps:$4 sm:$0xff]   ;;  %v1585_v4 = vld [vmem:[#allocation5 + $0x1c] ss:$12 sps:$4 sm:$0xff]   ;;  %v82_v9 = vpack.c.bf16 %v81_v6, %v81_v6 }
  0x4d   :  { %1552 = vmatprep.mubr.msk.bf16.mxu1 %vm1898_vm0, %v1897_v1  ;;  %144 = vmatprep.subr.bf16.mxu0 %v1582_v2  ;;  %v1587_v5 = vld [vmem:[#allocation5 + $0x18] ss:$12 sps:$4 sm:$0xff]   ;;  %v1588_v7 = vld [vmem:[#allocation5 + $0x8] ss:$12 sps:$4 sm:$0xff]   ;;  %v1589_v8 = vld [vmem:[#allocation5 + $0x20] ss:$12 sps:$4 sm:$0xff]  }
  0x4e   :  { %145 = vmatpush1.bf16.msra.mxu0 %v1584_v3  ;;  %1549 = vmatpush3.bf16.msra.mxu1 %v1588_v7  ;;  %v1592_v10 = vld [vmem:[#allocation7 + $0x4] ss:$16 sps:$4 sm:$0xff]   ;;  %vm140_vm1 = vcmask 261120   ;;  %v1590_v11 = vld [vmem:[#allocation7] ss:$16 sps:$4 sm:$0xff]   ;;  %s1899_s8 = smov [#allocation10]  }
  0x4f   :  { %146 = vmatprep.subr.bf16.mxu0 %v1585_v4  ;;  %1550 = vmatprep.subr.bf16.mxu1 %v1897_v1  ;;  %v1595_v12 = vld [vmem:[#allocation7 + $0xc] ss:$16 sps:$4 sm:$0xff]   ;;  %v1598_v13 = vld [vmem:[#allocation7 + $0x24] ss:$16 sps:$4 sm:$0xff]   ;;  %v1593_v14 = vld [vmem:[#allocation7 + $0x8] ss:$16 sps:$4 sm:$0xff]  }
  0x50   :  { %v1601_v15 = vld [vmem:[#allocation7 + $0x2c] ss:$16 sps:$4 sm:$0xff]   ;;  %v1596_v16 = vld [vmem:[#allocation7 + $0x20] ss:$16 sps:$4 sm:$0xff]   ;;  %v1604_v17 = vld [vmem:[#allocation7 + $0x44] ss:$16 sps:$4 sm:$0xff]  }
  0x51   :  { %v1599_v18 = vld [vmem:[#allocation7 + $0x28] ss:$16 sps:$4 sm:$0xff]   ;;  %v1607_v19 = vld [vmem:[#allocation7 + $0x4c] ss:$16 sps:$4 sm:$0xff]   ;;  %v1602_v20 = vld [vmem:[#allocation7 + $0x40] ss:$16 sps:$4 sm:$0xff]  }
  0x52   :  { %147 = vmatpush1.bf16.msra.mxu0 %v1587_v5  ;;  %1551 = vmatpush3.bf16.msra.mxu1 %v1589_v8  ;;  %v1610_v21 = vld [vmem:[#allocation7 + $0x64] ss:$16 sps:$4 sm:$0xff]   ;;  %v1605_v22 = vld [vmem:[#allocation7 + $0x48] ss:$16 sps:$4 sm:$0xff]   ;;  %v1613_v23 = vld [vmem:[#allocation7 + $0x6c] ss:$16 sps:$4 sm:$0xff]  }
  0x53   :  { %829 = vmatprep.subr.bf16.mxu0 %v1592_v10  ;;  %911 = vmatprep.subr.bf16.mxu1 %v1595_v12  ;;  %v1608_v24 = vld [vmem:[#allocation7 + $0x60] ss:$16 sps:$4 sm:$0xff]   ;;  %v1616_v25 = vld [vmem:[#allocation7 + $0x84] ss:$16 sps:$4 sm:$0xff]   ;;  %v1611_v26 = vld [vmem:[#allocation7 + $0x68] ss:$16 sps:$4 sm:$0xff]  }
  0x54   :  { %v1619_v27 = vld [vmem:[#allocation7 + $0x8c] ss:$16 sps:$4 sm:$0xff]   ;;  %v1614_v28 = vld [vmem:[#allocation7 + $0x80] ss:$16 sps:$4 sm:$0xff]   ;;  %v1622_v29 = vld [vmem:[#allocation7 + $0xa4] ss:$16 sps:$4 sm:$0xff]  }
  0x55   :  { %1370 = vmatmul.mubr.msk.bf16.vlgmr.msra.gmra.mrb[0].mxu0 %vm140_vm1, %v82_v9  ;;  %1553 = vmatmul.mubr.msk.bf16.vlgmr.msra.gmra.mrb[0].mxu1 %vm140_vm1, %v82_v9  ;;  %v1617_v30 = vld [vmem:[#allocation7 + $0x88] ss:$16 sps:$4 sm:$0xff]   ;;  %v1625_v31 = vld [vmem:[#allocation7 + $0xac] ss:$16 sps:$4 sm:$0xff]   ;;  %v1620_v32 = vld [vmem:[#allocation7 + $0xa0] ss:$16 sps:$4 sm:$0xff]  }
  0x56   :  { %830 = vmatpush1.bf16.msra.mxu0 %v1590_v11  ;;  %912 = vmatpush1.bf16.msra.mxu1 %v1593_v14  ;;  %v1628_v33 = vld [vmem:[#allocation7 + $0xc4] ss:$16 sps:$4 sm:$0xff]   ;;  %v1623_v34 = vld [vmem:[#allocation7 + $0xa8] ss:$16 sps:$4 sm:$0xff]   ;;  %v1631_v35 = vld [vmem:[#allocation7 + $0xcc] ss:$16 sps:$4 sm:$0xff]  }
  0x57   :  { %831 = vmatprep.subr.bf16.mxu0 %v1598_v13  ;;  %913 = vmatprep.subr.bf16.mxu1 %v1601_v15  ;;  %v1626_v36 = vld [vmem:[#allocation7 + $0xc0] ss:$16 sps:$4 sm:$0xff]   ;;  %v1634_v37 = vld [vmem:[#allocation7 + $0xe4] ss:$16 sps:$4 sm:$0xff]   ;;  %v1629_v38 = vld [vmem:[#allocation7 + $0xc8] ss:$16 sps:$4 sm:$0xff]   ;;  %v93_v13 = vlaneseq }
  0x58   :  { %v1637_v39 = vld [vmem:[#allocation7 + $0xec] ss:$16 sps:$4 sm:$0xff]   ;;  %v1632_v40 = vld [vmem:[#allocation7 + $0xe0] ss:$16 sps:$4 sm:$0xff]   ;;  %v1640_v41 = vld [vmem:[#allocation7 + $0x104] ss:$16 sps:$4 sm:$0xff]  }
  0x59   :  { %v1635_v42 = vld [vmem:[#allocation7 + $0xe8] ss:$16 sps:$4 sm:$0xff]   ;;  %v1643_v43 = vld [vmem:[#allocation7 + $0x10c] ss:$16 sps:$4 sm:$0xff]   ;;  %v1638_v44 = vld [vmem:[#allocation7 + $0x100] ss:$16 sps:$4 sm:$0xff]  }
  0x5a   :  { %832 = vmatpush1.bf16.msra.mxu0 %v1596_v16  ;;  %914 = vmatpush1.bf16.msra.mxu1 %v1599_v18  ;;  %v1641_v45 = vld [vmem:[#allocation7 + $0x108] ss:$16 sps:$4 sm:$0xff]   ;;  %v1646_v46 = vld [vmem:[#allocation7 + $0x124] ss:$16 sps:$4 sm:$0xff]   ;;  %v1644_v47 = vld [vmem:[#allocation7 + $0x120] ss:$16 sps:$4 sm:$0xff]  }
  0x5b   :  { %833 = vmatprep.subr.bf16.mxu0 %v1604_v17  ;;  %915 = vmatprep.subr.bf16.mxu1 %v1607_v19  ;;  %v1649_v48 = vld [vmem:[#allocation7 + $0x12c] ss:$16 sps:$4 sm:$0xff]   ;;  %v1652_v49 = vld [vmem:[#allocation7 + $0x144] ss:$16 sps:$4 sm:$0xff]   ;;  %v1647_v50 = vld [vmem:[#allocation7 + $0x128] ss:$16 sps:$4 sm:$0xff]  }
  0x5c   :  { %v1655_v51 = vld [vmem:[#allocation7 + $0x14c] ss:$16 sps:$4 sm:$0xff]   ;;  %v1650_v52 = vld [vmem:[#allocation7 + $0x140] ss:$16 sps:$4 sm:$0xff]   ;;  %v1658_v53 = vld [vmem:[#allocation7 + $0x164] ss:$16 sps:$4 sm:$0xff]  }
  0x5d   :  { %v1653_v54 = vld [vmem:[#allocation7 + $0x148] ss:$16 sps:$4 sm:$0xff]   ;;  %v1661_v55 = vld [vmem:[#allocation7 + $0x16c] ss:$16 sps:$4 sm:$0xff]   ;;  %v1656_v56 = vld [vmem:[#allocation7 + $0x160] ss:$16 sps:$4 sm:$0xff]  }
  0x5e   :  { %834 = vmatpush1.bf16.msra.mxu0 %v1602_v20  ;;  %916 = vmatpush1.bf16.msra.mxu1 %v1605_v22  ;;  %v1664_v57 = vld [vmem:[#allocation7 + $0x184] ss:$16 sps:$4 sm:$0xff]   ;;  %v1659_v58 = vld [vmem:[#allocation7 + $0x168] ss:$16 sps:$4 sm:$0xff]   ;;  %v1667_v59 = vld [vmem:[#allocation7 + $0x18c] ss:$16 sps:$4 sm:$0xff]  }
  0x5f   :  { %835 = vmatprep.subr.bf16.mxu0 %v1610_v21  ;;  %917 = vmatprep.subr.bf16.mxu1 %v1613_v23  ;;  %v1662_v60 = vld [vmem:[#allocation7 + $0x180] ss:$16 sps:$4 sm:$0xff]   ;;  %v1670_v61 = vld [vmem:[#allocation7 + $0x1a4] ss:$16 sps:$4 sm:$0xff]   ;;  %v1665_v62 = vld [vmem:[#allocation7 + $0x188] ss:$16 sps:$4 sm:$0xff]  }
  0x60   :  { %v1673_v63 = vld [vmem:[#allocation7 + $0x1ac] ss:$16 sps:$4 sm:$0xff]   ;;  %v1668_v1 = vld [vmem:[#allocation7 + $0x1a0] ss:$16 sps:$4 sm:$0xff]   ;;  %v1671_v2 = vld [vmem:[#allocation7 + $0x1a8] ss:$16 sps:$4 sm:$0xff]  }
  0x61   :  { %v1676_v3 = vld [vmem:[#allocation7 + $0x1c4] ss:$16 sps:$4 sm:$0xff]   ;;  %v1679_v4 = vld [vmem:[#allocation7 + $0x1cc] ss:$16 sps:$4 sm:$0xff]   ;;  %v1674_v5 = vld [vmem:[#allocation7 + $0x1c0] ss:$16 sps:$4 sm:$0xff]  }
  0x62   :  { %836 = vmatpush1.bf16.msra.mxu0 %v1608_v24  ;;  %918 = vmatpush1.bf16.msra.mxu1 %v1611_v26  ;;  %v1677_v6 = vld [vmem:[#allocation7 + $0x1c8] ss:$16 sps:$4 sm:$0xff]   ;;  %v1682_v7 = vld [vmem:[#allocation7 + $0x1e4] ss:$16 sps:$4 sm:$0xff]   ;;  %v1685_v8 = vld [vmem:[#allocation7 + $0x1ec] ss:$16 sps:$4 sm:$0xff]  }
  0x63   :  { %837 = vmatprep.subr.bf16.mxu0 %v1616_v25  ;;  %919 = vmatprep.subr.bf16.mxu1 %v1619_v27  ;;  %v1680_v9 = vld [vmem:[#allocation7 + $0x1e0] ss:$16 sps:$4 sm:$0xff]   ;;  %v1683_v10 = vld [vmem:[#allocation7 + $0x1e8] ss:$16 sps:$4 sm:$0xff]   ;;  %v1688_v11 = vld [vmem:[#allocation7 + $0x204] ss:$16 sps:$4 sm:$0xff]  }
  0x64   :  { %v1691_v12 = vld [vmem:[#allocation7 + $0x20c] ss:$16 sps:$4 sm:$0xff]   ;;  %v1989_v14 = vshrl.u32 %v93_v13, 7  ;;  %v91_v16 = vld [vmem:[%s2032_s2] sm:$0x7]  ;;  %v1742_v13 = vld [vmem:[#allocation8 + $0x50] sm:$0xff]  }
  0x65   :  { %s1353_s9 = sshll.u32 %s1899_s8, 4  ;;  %s1354_s9 = int_to_ptr.vmem [resolvable:$true] %s1353_s9 }
  0x66   :  { %838 = vmatpush1.bf16.msra.mxu0 %v1614_v28  ;;  %920 = vmatpush1.bf16.msra.mxu1 %v1617_v30  ;;  %v95_v15 = vsub.s32 0, %v1989_v14  ;;  %v99_v17 = vsub.s32 1, %v1989_v14  ;;  %s1856_s10 = scalar_lea.vmem %s1354_s9, 128  ;;  %p1861_p5 = scmp.lt.s32.totalorder %s1354_s9, %s1354_s9 }
  0x67   :  { %839 = vmatprep.subr.bf16.mxu0 %v1622_v29  ;;  %921 = vmatprep.subr.bf16.mxu1 %v1625_v31  ;;  %p1857_p4 = scmp.ne.s32.totalorder %s1354_s9, %s1856_s10  ;;  %p1862_p6 = scmp.lt.s32.totalorder %s1856_s10, %s1856_s10 }
  0x68   :  { %v96_v18 = vrot.slane %v91_v16, %v95_v15  ;;  %v100_v19 = vrot.slane %v91_v16, %v99_v17 }
  0x69   :  { %p1863_p7 = por %p1862_p6, %p1861_p5 }
  0x6a   :  { %840 = vmatpush1.bf16.msra.mxu0 %v1620_v32  ;;  %922 = vmatpush1.bf16.msra.mxu1 %v1623_v34  ;;  %v1689_v34 = vld [vmem:[#allocation7 + $0x208] ss:$16 sps:$4 sm:$0xff]  }
  0x6b   :  { %841 = vmatprep.subr.bf16.mxu0 %v1628_v33  ;;  %923 = vmatprep.subr.bf16.mxu1 %v1631_v35  ;;  %v1686_v33 = vld [vmem:[#allocation7 + $0x200] ss:$16 sps:$4 sm:$0xff]   ;;  %p1864_p8 = pnand %p1863_p7, %p1857_p4 }
  0x6e   :  { %842 = vmatpush1.bf16.msra.mxu0 %v1626_v36  ;;  %924 = vmatpush1.bf16.msra.mxu1 %v1629_v38  ;;  %v1694_v36 = vld [vmem:[#allocation7 + $0x224] ss:$16 sps:$4 sm:$0xff]   ;;  %v1692_v38 = vld [vmem:[#allocation7 + $0x220] ss:$16 sps:$4 sm:$0xff]  }
  0x6f   :  { %843 = vmatprep.subr.bf16.mxu0 %v1634_v37  ;;  %925 = vmatprep.subr.bf16.mxu1 %v1637_v39  ;;  %v1697_v37 = vld [vmem:[#allocation7 + $0x22c] ss:$16 sps:$4 sm:$0xff]   ;;  %v1695_v39 = vld [vmem:[#allocation7 + $0x228] ss:$16 sps:$4 sm:$0xff]  }
  0x72   :  { %844 = vmatpush1.bf16.msra.mxu0 %v1632_v40  ;;  %926 = vmatpush1.bf16.msra.mxu1 %v1635_v42  ;;  %v1700_v40 = vld [vmem:[#allocation7 + $0x244] ss:$16 sps:$4 sm:$0xff]   ;;  %v1698_v42 = vld [vmem:[#allocation7 + $0x240] ss:$16 sps:$4 sm:$0xff]  }
  0x73   :  { %845 = vmatprep.subr.bf16.mxu0 %v1640_v41  ;;  %927 = vmatprep.subr.bf16.mxu1 %v1643_v43  ;;  %v1703_v41 = vld [vmem:[#allocation7 + $0x24c] ss:$16 sps:$4 sm:$0xff]   ;;  %v1701_v43 = vld [vmem:[#allocation7 + $0x248] ss:$16 sps:$4 sm:$0xff]  }
  0x76   :  { %846 = vmatpush1.bf16.msra.mxu0 %v1638_v44  ;;  %928 = vmatpush1.bf16.msra.mxu1 %v1641_v45  ;;  %v1706_v44 = vld [vmem:[#allocation7 + $0x264] ss:$16 sps:$4 sm:$0xff]   ;;  %v1709_v45 = vld [vmem:[#allocation7 + $0x26c] ss:$16 sps:$4 sm:$0xff]  }
  0x77   :  { %847 = vmatprep.subr.bf16.mxu0 %v1646_v46  ;;  %929 = vmatprep.subr.bf16.mxu1 %v1649_v48  ;;  %v1704_v46 = vld [vmem:[#allocation7 + $0x260] ss:$16 sps:$4 sm:$0xff]   ;;  %v1712_v48 = vld [vmem:[#allocation7 + $0x284] ss:$16 sps:$4 sm:$0xff]  }
  0x7a   :  { %848 = vmatpush1.bf16.msra.mxu0 %v1644_v47  ;;  %930 = vmatpush1.bf16.msra.mxu1 %v1647_v50  ;;  %v1707_v47 = vld [vmem:[#allocation7 + $0x268] ss:$16 sps:$4 sm:$0xff]   ;;  %v103_v50 = vsub.s32 2, %v1989_v14 }
  0x7b   :  { %849 = vmatprep.subr.bf16.mxu0 %v1652_v49  ;;  %931 = vmatprep.subr.bf16.mxu1 %v1655_v51  ;;  %v1715_v49 = vld [vmem:[#allocation7 + $0x28c] ss:$16 sps:$4 sm:$0xff]   ;;  %v1713_v51 = vld [vmem:[#allocation7 + $0x288] ss:$16 sps:$4 sm:$0xff]  }
  0x7e   :  { %850 = vmatpush1.bf16.msra.mxu0 %v1650_v52  ;;  %932 = vmatpush1.bf16.msra.mxu1 %v1653_v54  ;;  %v1718_v52 = vld [vmem:[#allocation7 + $0x2a4] ss:$16 sps:$4 sm:$0xff]   ;;  %v104_v54 = vrot.slane %v91_v16, %v103_v50 }
  0x7f   :  { %851 = vmatprep.subr.bf16.mxu0 %v1658_v53  ;;  %933 = vmatprep.subr.bf16.mxu1 %v1661_v55  ;;  %v1721_v53 = vld [vmem:[#allocation7 + $0x2ac] ss:$16 sps:$4 sm:$0xff]   ;;  %v1716_v55 = vld [vmem:[#allocation7 + $0x2a0] ss:$16 sps:$4 sm:$0xff]  }
  0x80   :  { %v1743_v16 = vld [vmem:[#allocation8 + $0xd0] sm:$0xff]  }
  0x82   :  { %852 = vmatpush1.bf16.msra.mxu0 %v1656_v56  ;;  %934 = vmatpush1.bf16.msra.mxu1 %v1659_v58  ;;  %v1719_v56 = vld [vmem:[#allocation7 + $0x2a8] ss:$16 sps:$4 sm:$0xff]   ;;  %v1727_v58 = vld [vmem:[#allocation7 + $0x2cc] ss:$16 sps:$4 sm:$0xff]  }
  0x83   :  { %853 = vmatprep.subr.bf16.mxu0 %v1664_v57  ;;  %935 = vmatprep.subr.bf16.mxu1 %v1667_v59  ;;  %v1724_v57 = vld [vmem:[#allocation7 + $0x2c4] ss:$16 sps:$4 sm:$0xff]  }
  0x86   :  { %854 = vmatpush1.bf16.msra.mxu0 %v1662_v60  ;;  %936 = vmatpush1.bf16.msra.mxu1 %v1665_v62  ;;  %v1722_v60 = vld [vmem:[#allocation7 + $0x2c0] ss:$16 sps:$4 sm:$0xff]   ;;  %v1730_v62 = vld [vmem:[#allocation7 + $0x2e4] ss:$16 sps:$4 sm:$0xff]  }
  0x87   :  { %855 = vmatprep.subr.bf16.mxu0 %v1670_v61  ;;  %937 = vmatprep.subr.bf16.mxu1 %v1673_v63  ;;  %v1725_v61 = vld [vmem:[#allocation7 + $0x2c8] ss:$16 sps:$4 sm:$0xff]   ;;  %v1733_v63 = vld [vmem:[#allocation7 + $0x2ec] ss:$16 sps:$4 sm:$0xff]  }
  0x8a   :  { %856 = vmatpush1.bf16.msra.mxu0 %v1668_v1  ;;  %938 = vmatpush1.bf16.msra.mxu1 %v1671_v2  ;;  %v1728_v2 = vld [vmem:[#allocation7 + $0x2e0] ss:$16 sps:$4 sm:$0xff]  }
  0x8b   :  { %857 = vmatprep.subr.bf16.mxu0 %v1676_v3  ;;  %939 = vmatprep.subr.bf16.mxu1 %v1679_v4  ;;  %v1731_v3 = vld [vmem:[#allocation7 + $0x2e8] ss:$16 sps:$4 sm:$0xff]   ;;  %v1734_v4 = vld [vmem:[#allocation8 + $0x40] sm:$0xff]  }
  0x8e   :  { %858 = vmatpush1.bf16.msra.mxu0 %v1674_v5  ;;  %940 = vmatpush1.bf16.msra.mxu1 %v1677_v6  ;;  %v1735_v5 = vld [vmem:[#allocation8 + $0xc0] sm:$0xff]  }
  0x8f   :  { %859 = vmatprep.subr.bf16.mxu0 %v1682_v7  ;;  %941 = vmatprep.subr.bf16.mxu1 %v1685_v8  ;;  %v1736_v7 = vld [vmem:[#allocation8] sm:$0xff]  }
  0x90   :  { %v1737_v8 = vld [vmem:[#allocation8 + $0x80] sm:$0xff]  }
  0x92   :  { %860 = vmatpush1.bf16.msra.mxu0 %v1680_v9  ;;  %942 = vmatpush1.bf16.msra.mxu1 %v1683_v10  ;;  %v1738_v9 = vld [vmem:[#allocation8 + $0x48] sm:$0xff]  }
  0x93   :  { %870 = vmatprep.subr.bf16.mxu0 %v1688_v11  ;;  %952 = vmatprep.subr.bf16.mxu1 %v1691_v12  ;;  %v1739_v10 = vld [vmem:[#allocation8 + $0xc8] sm:$0xff]  }
  0x94   :  { %v1740_v11 = vld [vmem:[#allocation8 + $0x8] sm:$0xff]  }
  0x95   :  { %v1741_v12 = vld [vmem:[#allocation8 + $0x88] sm:$0xff]  }
 0x128   :  { %v178_v20 = vpop.f32.mrb[0].mxu0  ;;  %v219_v25 = vpop.f32.mrb[0].mxu1 }
 0x129   :  { %v179_v21 = vadd.f32 %v178_v20, %v96_v18  ;;  %v180_v22 = vpop.f32.mrb[1].mxu0  ;;  %v1554_v28 = vpop.f32.mrb[1].mxu1  ;;  %v220_v59 = vadd.f32 %v219_v25, %v104_v54  ;;  %v1744_v18 = vld [vmem:[#allocation8 + $0x10] sm:$0xff]   ;;  %v1746_v20 = vld [vmem:[#allocation8 + $0x58] sm:$0xff]   ;;  %v1751_v25 = vld [vmem:[#allocation8 + $0xe0] sm:$0xff]  }
 0x12a   :  { %v181_v23 = vadd.f32 %v180_v22, %v100_v19  ;;  %v182_v24 = vpop.f32.mrb[2].mxu0  ;;  %v222_v30 = vpop.f32.mrb[2].mxu1  ;;  %v1745_v19 = vld [vmem:[#allocation8 + $0x90] sm:$0xff]   ;;  %v1748_v22 = vld [vmem:[#allocation8 + $0x18] sm:$0xff]   ;;  %v1754_v28 = vld [vmem:[#allocation8 + $0x68] sm:$0xff]  }
 0x12b   :  { %v225_v26 = vmax.f32 %v179_v21, 0.0  ;;  %v183_v27 = vpop.f32.mrb[3].mxu0  ;;  %v1555_v31 = vpop.f32.mrb[3].mxu1  ;;  %v227_v1 = vmax.f32 %v220_v59, 0.0  ;;  %v1747_v21 = vld [vmem:[#allocation8 + $0xd8] sm:$0xff]   ;;  %v1750_v24 = vld [vmem:[#allocation8 + $0x60] sm:$0xff]  }
 0x12c   :  { %v226_v29 = vmax.f32 %v181_v23, 0.0  ;;  %v1749_v23 = vld [vmem:[#allocation8 + $0x98] sm:$0xff]   ;;  %v1753_v27 = vld [vmem:[#allocation8 + $0xa0] sm:$0xff]   ;;  %v1756_v30 = vld [vmem:[#allocation8 + $0x28] sm:$0xff]  }
 0x12d   :  { %v228_v35 = vpack.c.bf16 %v225_v26, %v225_v26  ;;  %v230_v6 = vpack.c.bf16 %v227_v1, %v227_v1  ;;  %v1752_v26 = vld [vmem:[#allocation8 + $0x20] sm:$0xff]   ;;  %v1757_v31 = vld [vmem:[#allocation8 + $0xa8] sm:$0xff]  }
 0x12e   :  { %v229_v32 = vpack.c.bf16 %v226_v29, %v226_v29  ;;  %v1755_v29 = vld [vmem:[#allocation8 + $0xe8] sm:$0xff]  }
 0x12f   :  { %v1468_v1 = vld [vmem:[%s2036_s6] ss:$0 sm:$0xff] }
 0x130   :  { %861 = vmatprep.mubr.bf16.mxu0 %v229_v32  ;;  %943 = vmatprep.mubr.bf16.mxu1 %v229_v32  ;;  %v1758_v32 = vld [vmem:[#allocation8 + $0x70] sm:$0xff]  }
 0x131   :  { %862 = vmatmul.mubr.bf16.vlgmr.msra.gmra.mrb[4].mxu0 %v228_v35  ;;  %944 = vmatmul.mubr.bf16.vlgmr.msra.gmra.mrb[4].mxu1 %v228_v35  ;;  %v1761_v35 = vld [vmem:[#allocation8 + $0xb0] sm:$0xff]  }
 0x132   :  { %871 = vmatpush1.bf16.msra.mxu0 %v1686_v33  ;;  %953 = vmatpush1.bf16.msra.mxu1 %v1689_v34  ;;  %v1759_v33 = vld [vmem:[#allocation8 + $0xf0] sm:$0xff]  }
 0x133   :  { %872 = vmatprep.subr.bf16.mxu0 %v1694_v36  ;;  %954 = vmatprep.subr.bf16.mxu1 %v1697_v37  ;;  %v1760_v34 = vld [vmem:[#allocation8 + $0x30] sm:$0xff]   ;;  %v1762_v36 = vld [vmem:[#allocation8 + $0x78] sm:$0xff]  }
 0x134   :  { %902 = vmatprep.mubr.bf16.mxu0 %v1896_v0  ;;  %984 = vmatprep.mubr.bf16.mxu1 %v1896_v0  ;;  %v1710_v0 = vld [vmem:[#allocation7 + $0x280] ss:$16 sps:$4 sm:$0xff]   ;;  %v1763_v37 = vld [vmem:[#allocation8 + $0xf8] sm:$0xff]  }
 0x136   :  { %873 = vmatpush1.bf16.msra.mxu0 %v1692_v38  ;;  %955 = vmatpush1.bf16.msra.mxu1 %v1695_v39  ;;  %v1764_v38 = vld [vmem:[#allocation8 + $0x38] sm:$0xff]  }
 0x137   :  { %874 = vmatprep.subr.bf16.mxu0 %v1700_v40  ;;  %956 = vmatprep.subr.bf16.mxu1 %v1703_v41  ;;  %v1765_v39 = vld [vmem:[#allocation8 + $0xb8] sm:$0xff]   ;;  %v327_v40 = vld [vmem:[%s2034_s4] sm:$0xf]  ;;  %v343_v41 = vsub.s32 3, %v1989_v14 }
 0x13a   :  { %875 = vmatpush1.bf16.msra.mxu0 %v1698_v42  ;;  %957 = vmatpush1.bf16.msra.mxu1 %v1701_v43  ;;  %v332_v42 = vrot.slane %v327_v40, %v95_v15  ;;  %v340_v43 = vrot.slane %v327_v40, %v103_v50 }
 0x13b   :  { %876 = vmatprep.subr.bf16.mxu0 %v1706_v44  ;;  %958 = vmatprep.subr.bf16.mxu1 %v1709_v45  ;;  %v336_v44 = vrot.slane %v327_v40, %v99_v17  ;;  %v344_v45 = vrot.slane %v327_v40, %v343_v41 }
 0x13e   :  { %877 = vmatpush1.bf16.msra.mxu0 %v1704_v46  ;;  %959 = vmatpush1.bf16.msra.mxu1 %v1707_v47 }
 0x13f   :  { %878 = vmatprep.subr.bf16.mxu0 %v1712_v48  ;;  %960 = vmatprep.subr.bf16.mxu1 %v1715_v49 }
 0x142   :  { %879 = vmatpush1.bf16.msra.mxu0 %v1710_v0  ;;  %961 = vmatpush1.bf16.msra.mxu1 %v1713_v51 }
 0x143   :  { %880 = vmatprep.subr.bf16.mxu0 %v1718_v52  ;;  %962 = vmatprep.subr.bf16.mxu1 %v1721_v53 }
 0x146   :  { %881 = vmatpush1.bf16.msra.mxu0 %v1716_v55  ;;  %963 = vmatpush1.bf16.msra.mxu1 %v1719_v56 }
 0x147   :  { %882 = vmatprep.subr.bf16.mxu0 %v1724_v57  ;;  %964 = vmatprep.subr.bf16.mxu1 %v1727_v58 }
 0x14a   :  { %883 = vmatpush1.bf16.msra.mxu0 %v1722_v60  ;;  %965 = vmatpush1.bf16.msra.mxu1 %v1725_v61 }
 0x14b   :  { %884 = vmatprep.subr.bf16.mxu0 %v1730_v62  ;;  %966 = vmatprep.subr.bf16.mxu1 %v1733_v63 }
 0x14e   :  { %885 = vmatpush1.bf16.msra.mxu0 %v1728_v2  ;;  %967 = vmatpush1.bf16.msra.mxu1 %v1731_v3 }
 0x14f   :  { %1504 = vmatprep.subr.bf16.mxu0 %v1734_v4  ;;  %1526 = vmatprep.subr.bf16.mxu1 %v1735_v5 }
 0x151   :  { %903 = vmatmul.mubr.bf16.vlgmr.msra.gmra.mrb[4].mxu0 %v230_v6  ;;  %985 = vmatmul.mubr.bf16.vlgmr.msra.gmra.mrb[4].mxu1 %v230_v6 }
 0x152   :  { %1505 = vmatpush3.bf16.msra.mxu0 %v1736_v7  ;;  %1527 = vmatpush3.bf16.msra.mxu1 %v1737_v8 }
 0x153   :  { %1506 = vmatprep.subr.bf16.mxu0 %v1738_v9  ;;  %1528 = vmatprep.subr.bf16.mxu1 %v1739_v10 }
 0x156   :  { %1507 = vmatpush3.bf16.msra.mxu0 %v1740_v11  ;;  %1529 = vmatpush3.bf16.msra.mxu1 %v1741_v12 }
 0x157   :  { %1508 = vmatprep.subr.bf16.mxu0 %v1742_v13  ;;  %1530 = vmatprep.subr.bf16.mxu1 %v1743_v16 }
 0x15a   :  { %1509 = vmatpush3.bf16.msra.mxu0 %v1744_v18  ;;  %1531 = vmatpush3.bf16.msra.mxu1 %v1745_v19 }
 0x15b   :  { %1510 = vmatprep.subr.bf16.mxu0 %v1746_v20  ;;  %1532 = vmatprep.subr.bf16.mxu1 %v1747_v21 }
 0x15e   :  { %1511 = vmatpush3.bf16.msra.mxu0 %v1748_v22  ;;  %1533 = vmatpush3.bf16.msra.mxu1 %v1749_v23 }
 0x15f   :  { %1512 = vmatprep.subr.bf16.mxu0 %v1750_v24  ;;  %1534 = vmatprep.subr.bf16.mxu1 %v1751_v25 }
 0x162   :  { %1513 = vmatpush3.bf16.msra.mxu0 %v1752_v26  ;;  %1535 = vmatpush3.bf16.msra.mxu1 %v1753_v27 }
 0x163   :  { %1514 = vmatprep.subr.bf16.mxu0 %v1754_v28  ;;  %1536 = vmatprep.subr.bf16.mxu1 %v1755_v29 }
 0x166   :  { %1515 = vmatpush3.bf16.msra.mxu0 %v1756_v30  ;;  %1537 = vmatpush3.bf16.msra.mxu1 %v1757_v31 }
 0x167   :  { %1516 = vmatprep.subr.bf16.mxu0 %v1758_v32  ;;  %1538 = vmatprep.subr.bf16.mxu1 %v1759_v33 }
 0x16a   :  { %1517 = vmatpush3.bf16.msra.mxu0 %v1760_v34  ;;  %1539 = vmatpush3.bf16.msra.mxu1 %v1761_v35 }
 0x16b   :  { %1518 = vmatprep.subr.bf16.mxu0 %v1762_v36  ;;  %1540 = vmatprep.subr.bf16.mxu1 %v1763_v37 }
 0x16e   :  { %1519 = vmatpush3.bf16.msra.mxu0 %v1764_v38  ;;  %1541 = vmatpush3.bf16.msra.mxu1 %v1765_v39 }
 0x224   :  { %v904_v46 = vpop.f32.mrb[4].mxu0  ;;  %v986_v47 = vpop.f32.mrb[4].mxu1 }
 0x225   :  { %v1556_v48 = vadd.f32 %v904_v46, %v332_v42  ;;  %v1558_v49 = vadd.f32 %v986_v47, %v340_v43  ;;  %v906_v0 = vpop.f32.mrb[5].mxu0  ;;  %v988_v51 = vpop.f32.mrb[5].mxu1 }
 0x226   :  { %v1557_v52 = vadd.f32 %v906_v0, %v336_v44  ;;  %v1559_v53 = vadd.f32 %v988_v51, %v344_v45  ;;  %v908_v54 = vpop.f32.mrb[6].mxu0  ;;  %v990_v55 = vpop.f32.mrb[6].mxu1 }
 0x227   :  { %v993_v56 = vmax.f32 %v1556_v48, 0.0  ;;  %v995_v57 = vmax.f32 %v1558_v49, 0.0  ;;  %v909_v15 = vpop.f32.mrb[7].mxu0  ;;  %v991_v58 = vpop.f32.mrb[7].mxu1 }
 0x228   :  { %v994_v59 = vmax.f32 %v1557_v52, 0.0  ;;  %v996_v50 = vmax.f32 %v1559_v53, 0.0 }
 0x229   :  { %v997_v17 = vpack.c.bf16 %v993_v56, %v993_v56  ;;  %v999_v61 = vpack.c.bf16 %v995_v57, %v995_v57 }
 0x22a   :  { %v998_v60 = vpack.c.bf16 %v994_v59, %v994_v59  ;;  %v1000_v14 = vpack.c.bf16 %v996_v50, %v996_v50 }
 0x22c   :  { %1296 = vmatprep.mubr.bf16.mxu0 %v998_v60  ;;  %1336 = vmatprep.mubr.bf16.mxu1 %v1000_v14 }
 0x22d   :  { %1297 = vmatmul.mubr.bf16.vlgmr.msra.gmra.mrb[8].mxu0 %v997_v17  ;;  %1337 = vmatmul.mubr.bf16.vlgmr.msra.gmra.mrb[8].mxu1 %v999_v61 }
 0x300   :  { %v1520_v62 = vpop.f32.mrb[8].mxu0  ;;  %v1542_v63 = vpop.f32.mrb[8].mxu1 }
 0x301   :  { %v1521_v2 = vpop.f32.mrb[9].mxu0  ;;  %v1543_v3 = vpop.f32.mrb[9].mxu1 }
 0x302   :  { %v1522_v4 = vadd.f32 %v1521_v2, %v1520_v62  ;;  %v1544_v5 = vadd.f32 %v1543_v3, %v1542_v63  ;;  %v1523_v6 = vpop.f32.mrb[10].mxu0  ;;  %v1545_v7 = vpop.f32.mrb[10].mxu1 }
 0x303   :  { %v1524_v8 = vpop.f32.mrb[11].mxu0  ;;  %v1546_v9 = vpop.f32.mrb[11].mxu1 }
 0x304   :  { %v1299_v10 = vadd.f32 %v1522_v4, %v1468_v1 }
 0x306   :  { %v1339_v11 = vadd.f32 %v1544_v5, %v1299_v10 }
 0x308   :  { %1766 = vtanh.f32 %v1339_v11 }
 0x312   :  { %v1767_v12 = vpop.eup %1766 }
 0x313   :  { %v1345_v13 = vmul.f32 2.0, %v1767_v12 }
 0x315   :  { %1346 = vst [vmem:[#allocation10] sm:$0xff] %v1345_v13 }
 0x316   :  { %1867 = shalt.err (!%p1864_p8)
}
 0x317   :  { %s1868_s12 = scalar_lea.hbm %s2037_s7, 128 }
 0x318   :  { %p1869_p9 = scmp.ne.s32.totalorder %s2037_s7, %s1868_s12  ;;  %p1872_p10 = scmp.lt.u32.totalorder %s1868_s12, %s2037_s7 }
 0x31a   :  { %p1874_p11 = pnand %p1872_p10, %p1869_p9 }
 0x31c   :  { %1877 = shalt.err (!%p1874_p11)
}
 0x31d   :  { %1356 = dma.vmem_to_hbm [thread:$0]  %s1354_s9, 128, %s2037_s7, [#allocation4]  }
 0x31e   :  { %1884 = dma.done.wait [#allocation4], 128  }
 0x31f   :  { %1885 = vsyncadd [#allocation4], 4294967168 }
 0x320   :  { %1360 = vsyncpa [#allocation3], 1 }
 0x321   :  { %1361 = vsyncpa [#allocation6], 1 }
 0x322   :  { %1362 = vsyncpa [#allocation9], 1 }
 0x323   :  { %1363 = vsyncpa [#allocation4], 1 }

</bundles_post_ra>
